<compile_context>
chip_gen: v7x
topology: tpu7x:2x2x1
jax: 0.10.0
libtpu: 0.0.40
codegen_flags: <defaults>
</compile_context>

<pallas_src>
import functools

import jax
import jax.numpy as jnp
from jax import lax
from jax.experimental import pallas as pl
from jax.experimental.pallas import tpu as pltpu


def _round_up(x, m):
    return (x + m - 1) // m * m


def _vmem_capacity_bytes():
    """Physical VMEM per TensorCore (128 MiB on v5e/v6e, 64 MiB on v7x)."""
    try:
        return int(pltpu.get_tpu_info().vmem_capacity_bytes)
    except Exception:
        return 64 << 20  # conservative (v7x) if the query is unavailable


def _pick_tile_h(H, W, target_rows):
    """Row-tile height: divides H, T_H*W lane-aligned (%128), <= target_rows."""
    divs = [th for th in range(1, H + 1) if H % th == 0]
    aligned = [th for th in divs if (th * W) % 128 == 0]
    small = [th for th in aligned if th * W <= target_rows]
    if small:
        return max(small)
    if aligned:
        # No aligned tile under the row target: take the smallest aligned tile
        # instead of collapsing to the whole image (avoids VMEM blowup).
        return min(aligned)
    # TODO(synk): H*W not 128-alignable (odd W): whole-image block stays legal
    # (block == full dim); pad W + mask BN stats to tile such shapes.
    return H


def _pick_bn_group(n_tiles, tile_bytes, budget):
    """How many row tiles to fuse per BN/ReLU grid step (divisor of n_tiles)."""
    ks = [k for k in range(1, n_tiles + 1)
          if n_tiles % k == 0 and k * tile_bytes <= budget]
    return max(ks) if ks else 1


# ---------------------------------------------------------------------------
# Kernels
# ---------------------------------------------------------------------------

def _build_patches(main_ref, h0_ref, h1_ref, *, T_H, W, Cin):
    """On-chip im2col: (T_H*W, 9*Cin) patch tile from a (T_H+2)-row halo slab.

    The slab arrives as one T_H-row block plus two 1-row halo blocks of the
    same padded NHWC array (overlapping windows via plain Blocked index_maps),
    so neither the halo duplication nor the 9x expansion ever touches HBM.
    """
    slab = jnp.concatenate([main_ref[...], h0_ref[...], h1_ref[...]], axis=0)
    taps = [slab[dy:dy + T_H, dx:dx + W, :]
            for dy in range(3) for dx in range(3)]     # 9 x (T_H, W, Cin)
    p = jnp.concatenate(taps, axis=-1)                 # (T_H, W, 9*Cin)
    return p.reshape(T_H * W, 9 * Cin)


# Contract K of (Cout_p, K) x (T_HW, K): MXU emits (Cout_p, T_HW) directly
# (NCHW layout), no XLU transpose of the accumulator.
_NT_DIMS = (((1,), (1,)), ((), ()))


def _conv_kernel(m_ref, h0_ref, h1_ref, w_ref, b_ref, y_ref,
                 *, Cout, T_H, W, Cin):
    p = _build_patches(m_ref, h0_ref, h1_ref, T_H=T_H, W=W, Cin=Cin)
    acc = lax.dot_general(w_ref[...], p, _NT_DIMS,
                          preferred_element_type=jnp.float32) + b_ref[...]
    y_ref[...] = acc[:Cout, :].astype(y_ref.dtype)     # lane-dense (Cout, T_HW)


def _conv_stats_kernel(m_ref, h0_ref, h1_ref, w_ref, b_ref,
                       y_ref, s_ref, ss_ref, *, Cout, T_H, W, Cin):
    p = _build_patches(m_ref, h0_ref, h1_ref, T_H=T_H, W=W, Cin=Cin)
    acc = lax.dot_general(w_ref[...], p, _NT_DIMS,
                          preferred_element_type=jnp.float32) + b_ref[...]
    # Raw per-tile moments; centering + Chan combine happens on the tiny
    # partials in XLA (f32 cancellation is benign at ~10^3 rows per tile).
    s_ref[...] = jnp.sum(acc, axis=1, keepdims=True)          # (Cout_p, 1)
    ss_ref[...] = jnp.sum(acc * acc, axis=1, keepdims=True)   # (Cout_p, 1)
    y_ref[...] = acc[:Cout, :].astype(y_ref.dtype)


def _bn_relu_kernel(y_ref, scale_ref, shift_ref, o_ref):
    y = y_ref[...].astype(jnp.float32)
    o_ref[...] = jnp.maximum(y * scale_ref[...] + shift_ref[...], 0.0)


# ---------------------------------------------------------------------------
# Wrapper
# ---------------------------------------------------------------------------

@functools.partial(jax.jit, static_argnames=("activation", "tile_rows",
                                              "compute_dtype"))
def convolution_forward(x, params, activation=True, eps=1e-5,
                        tile_rows=None, compute_dtype=jnp.bfloat16):
    """Equivalent of Convolution(in_channels, out_channels, activation)(x).

    x: (N, Cin, H, W) float32 (NCHW, like PyTorch). Returns (N, Cout, H, W) f32.
    """
    weight, bias = params["weight"], params["bias"]
    N, Cin, H, W = x.shape
    Cout = weight.shape[0]
    HW = H * W
    K = 9 * Cin
    Cout_p = _round_up(Cout, 128)

    cdt = jnp.dtype(compute_dtype)
    cb = cdt.itemsize
    vmem_cap = _vmem_capacity_bytes()
    vmem_budget = int(0.75 * vmem_cap)          # headroom for compiler temps
    if tile_rows is None:
        # v5e/v6e (128 MiB VMEM): big tiles amortize per-step overhead;
        # v7x (64 MiB): stay near 2048 im2col rows.
        tile_rows = 4096 if vmem_cap > (96 << 20) else 2048

    T_H = _pick_tile_h(H, W, tile_rows)
    n_tiles = H // T_H
    T_HW = T_H * W

    # bf16 intermediate (BN rescales anyway); final module output stays f32.
    inter_dtype = jnp.bfloat16 if cdt == jnp.bfloat16 else jnp.float32
    y_dtype = inter_dtype if activation else jnp.float32

    # --- glue: NCHW -> NHWC, zero-pad spatial borders, cast to compute dtype.
    # This is the only HBM staging array; halo windows are cut by BlockSpecs.
    x_pad = jnp.pad(jnp.transpose(x, (0, 2, 3, 1)),
                    ((0, 0), (1, 1), (1, 1), (0, 0))).astype(cdt)

    # PyTorch weight (Cout, Cin, 3, 3) -> (Cout, ky, kx, Cin) -> (Cout_p, 9*Cin)
    # (pre-transposed + zero-padded to 128 sublanes; bias as an f32 column).
    w_t = jnp.transpose(weight, (0, 2, 3, 1)).reshape(Cout, K)
    w_t = jnp.pad(w_t, ((0, Cout_p - Cout), (0, 0))).astype(cdt)
    b_col = jnp.pad(bias, (0, Cout_p - Cout)).reshape(Cout_p, 1).astype(jnp.float32)

    grid = (N, n_tiles)
    # Overlapping (T_H+2)-row windows of the SAME padded array: one T_H-row
    # block plus two 1-row halo blocks -> no slab duplication, auto-pipelined,
    # index maps are pure functions of (b, t) so both axes stay "parallel".
    main_spec = pl.BlockSpec((None, T_H, W + 2, Cin), lambda b, t: (b, t, 0, 0))
    halo0_spec = pl.BlockSpec((None, 1, W + 2, Cin),
                              lambda b, t: (b, (t + 1) * T_H, 0, 0))
    halo1_spec = pl.BlockSpec((None, 1, W + 2, Cin),
                              lambda b, t: (b, (t + 1) * T_H + 1, 0, 0))
    w_spec = pl.BlockSpec((Cout_p, K), lambda b, t: (0, 0))
    b_spec = pl.BlockSpec((Cout_p, 1), lambda b, t: (0, 0))
    y_spec = pl.BlockSpec((None, Cout, T_HW), lambda b, t: (b, 0, t))

    # Per-step VMEM footprint (double-buffered blocks + in-kernel temps).
    slab_b = (T_H + 2) * (W + 2) * Cin * cb
    y_b = jnp.dtype(y_dtype).itemsize
    est = (2 * slab_b                                   # input blocks (x2 bufs)
           + 2 * (Cout_p * K * cb + Cout_p * 4)         # weights + bias
           + 2 * Cout * T_HW * y_b                      # output blocks
           + 4 * 2 * Cout_p * 4                         # stats blocks
           + slab_b + 2 * T_HW * K * cb                 # concat slab + patches
           + 3 * Cout_p * T_HW * 4                      # f32 acc + temps
           + (1 << 20))
    vmem_limit = int(min(vmem_budget, max(24 << 20, 2 * est)))
    cparams = pltpu.CompilerParams(
        dimension_semantics=("parallel", "parallel"),
        vmem_limit_bytes=vmem_limit)
    conv_cost = pl.CostEstimate(
        flops=2 * N * HW * K * Cout_p,
        transcendentals=0,
        bytes_accessed=int(x_pad.size * cb + w_t.size * cb
                           + N * Cout * HW * y_b + 4 * N * n_tiles * Cout_p * 4))

    if not activation:
        y = pl.pallas_call(
            functools.partial(_conv_kernel, Cout=Cout, T_H=T_H, W=W, Cin=Cin),
            out_shape=jax.ShapeDtypeStruct((N, Cout, HW), y_dtype),
            grid=grid,
            in_specs=[main_spec, halo0_spec, halo1_spec, w_spec, b_spec],
            out_specs=y_spec,
            compiler_params=cparams,
            cost_estimate=conv_cost,
        )(x_pad, x_pad, x_pad, w_t, b_col)
        return y.reshape(N, Cout, H, W)

    # ---- Pallas kernel 1: conv matmul + bias + per-tile raw BN moments,
    # output written directly in NCHW layout (bf16 intermediate).
    stat_spec = pl.BlockSpec((None, None, Cout_p, 1), lambda b, t: (b, t, 0, 0))
    conv_y, psum, psq = pl.pallas_call(
        functools.partial(_conv_stats_kernel, Cout=Cout, T_H=T_H, W=W, Cin=Cin),
        out_shape=(
            jax.ShapeDtypeStruct((N, Cout, HW), inter_dtype),
            jax.ShapeDtypeStruct((N, n_tiles, Cout_p, 1), jnp.float32),
            jax.ShapeDtypeStruct((N, n_tiles, Cout_p, 1), jnp.float32),
        ),
        grid=grid,
        in_specs=[main_spec, halo0_spec, halo1_spec, w_spec, b_spec],
        out_specs=(y_spec, stat_spec, stat_spec),
        compiler_params=cparams,
        cost_estimate=conv_cost,
    )(x_pad, x_pad, x_pad, w_t, b_col)

    # ---- Chan parallel-variance combine of tiny per-tile partials (stable at
    # production N*H*W, unlike global E[x^2]-E[x]^2).
    s = psum[:, :, :Cout, 0]                     # (N, n_tiles, Cout)
    ss = psq[:, :, :Cout, 0]
    cnt = jnp.float32(T_HW)
    total = jnp.float32(N * HW)
    tile_mean = s / cnt
    tile_m2 = ss - s * tile_mean
    mean = jnp.sum(s, axis=(0, 1)) / total
    var = (jnp.sum(tile_m2, axis=(0, 1))
           + cnt * jnp.sum((tile_mean - mean) ** 2, axis=(0, 1))) / total
    var = jnp.maximum(var, 0.0)

    scale = (params["gamma"] / jnp.sqrt(var + eps)).astype(jnp.float32)
    shift = (params["beta"].astype(jnp.float32) - mean * scale)
    scale_col = scale.reshape(Cout, 1)
    shift_col = shift.reshape(Cout, 1)

    # ---- Pallas kernel 2: fused BN affine + ReLU. Pure HBM-bandwidth pass:
    # bf16 in / f32 out, coarse blocks (k row tiles per step) for long DMAs.
    tile_bytes = Cout * T_HW * (jnp.dtype(inter_dtype).itemsize + 4) * 2
    k = _pick_bn_group(n_tiles, tile_bytes, vmem_budget // 2)
    C_HW = k * T_HW
    y2_spec = pl.BlockSpec((None, Cout, C_HW), lambda b, t: (b, 0, t))
    bn_cost = pl.CostEstimate(
        flops=3 * N * Cout * HW, transcendentals=0,
        bytes_accessed=int(N * Cout * HW
                           * (jnp.dtype(inter_dtype).itemsize + 4)))
    y = pl.pallas_call(
        _bn_relu_kernel,
        out_shape=jax.ShapeDtypeStruct((N, Cout, HW), jnp.float32),
        grid=(N, n_tiles // k),
        in_specs=[y2_spec,
                  pl.BlockSpec((Cout, 1), lambda b, t: (0, 0)),
                  pl.BlockSpec((Cout, 1), lambda b, t: (0, 0))],
        out_specs=y2_spec,
        compiler_params=pltpu.CompilerParams(
            dimension_semantics=("parallel", "parallel"),
            vmem_limit_bytes=int(min(vmem_budget,
                                     max(24 << 20, 3 * tile_bytes)))),
        cost_estimate=bn_cost,
    )(conv_y, scale_col, shift_col)

    return y.reshape(N, Cout, H, W)


def reference_forward(x, params, activation=True, eps=1e-5):
    """Pure-JAX reference matching PyTorch Conv2d + BatchNorm2d(train) + ReLU."""
    y = lax.conv_general_dilated(
        x, params["weight"], window_strides=(1, 1), padding=((1, 1), (1, 1)),
        dimension_numbers=("NCHW", "OIHW", "NCHW"))
    y = y + params["bias"].reshape(1, -1, 1, 1)
    if activation:
        mean = jnp.mean(y, axis=(0, 2, 3), keepdims=True)
        var = jnp.var(y, axis=(0, 2, 3), keepdims=True)
        y = (y - mean) / jnp.sqrt(var + eps)
        y = y * params["gamma"].reshape(1, -1, 1, 1) + params["beta"].reshape(1, -1, 1, 1)
        y = jnp.maximum(y, 0.0)
    return y


if __name__ == "__main__":
    key = jax.random.PRNGKey(0)
    kx, kw, kb, kg, kbe = jax.random.split(key, 5)

    N, Cin, Cout, H, W = 2, 4, 8, 16, 16
    x = jax.random.normal(kx, (N, Cin, H, W), jnp.float32)
    params = {
        "weight": 0.1 * jax.random.normal(kw, (Cout, Cin, 3, 3), jnp.float32),
        "bias":   0.1 * jax.random.normal(kb, (Cout,), jnp.float32),
        "gamma":  1.0 + 0.1 * jax.random.normal(kg, (Cout,), jnp.float32),
        "beta":   0.1 * jax.random.normal(kbe, (Cout,), jnp.float32),
    }

    ref = reference_forward(x, params, activation=True)
    ref_conv = reference_forward(x, params, activation=False)

    # tile_rows=128 -> T_H=8, two row tiles per image (exercises the halo
    # windows and the cross-tile Chan stats combine).

    # f32 compute path: validates the exact algorithm (tiling, halos, BN).
    out_f32 = jax.block_until_ready(
        convolution_forward(x, params, activation=True, tile_rows=128,
                            compute_dtype=jnp.float32))
    assert out_f32.shape == (N, Cout, H, W), out_f32.shape
    err = float(jnp.max(jnp.abs(out_f32 - ref)))
    assert err < 5e-4, f"f32 path max err {err}"

    # bf16 compute path (default): bf16 MXU operands + bf16 intermediate.
    out_bf16 = jax.block_until_ready(
        convolution_forward(x, params, activation=True, tile_rows=128))
    err = float(jnp.max(jnp.abs(out_bf16 - ref)))
    assert err < 4e-2, f"bf16 path max err {err}"

    # Conv-only dispatch (activation=False), f32 final output.
    out_conv = jax.block_until_ready(
        convolution_forward(x, params, activation=False, tile_rows=128))
    err = float(jnp.max(jnp.abs(out_conv - ref_conv)))
    assert err < 2e-2, f"conv-only max err {err}"

    print("KERNEL_OK")
</pallas_src>

<mosaic_0001>
module attributes {stable_mosaic.version = 11 : i64} {
  func.func @_conv_stats_kernel(%arg0: i32, %arg1: i32, %arg2: memref<1x8x18x4xf32, #tpu.memory_space<vmem>>, %arg3: memref<1x1x18x4xf32, #tpu.memory_space<vmem>>, %arg4: memref<1x1x18x4xf32, #tpu.memory_space<vmem>>, %arg5: memref<128x36xf32, #tpu.memory_space<vmem>>, %arg6: memref<128x1xf32, #tpu.memory_space<vmem>>, %arg7: memref<1x8x128xf32, #tpu.memory_space<vmem>>, %arg8: memref<1x1x128x1xf32, #tpu.memory_space<vmem>>, %arg9: memref<1x1x128x1xf32, #tpu.memory_space<vmem>>) attributes {dimension_semantics = [#tpu.dimension_semantics<parallel>, #tpu.dimension_semantics<parallel>], iteration_bounds = array<i64: 2, 2>, scalar_prefetch = 0 : i64, scratch_operands = 0 : i64, tpu.core_type = #tpu.core_type<tc>, window_params = [{transform_indices = @transform_0, window_bounds = array<i64: 1, 8, 18, 4>}, {transform_indices = @transform_1, window_bounds = array<i64: 1, 1, 18, 4>}, {transform_indices = @transform_2, window_bounds = array<i64: 1, 1, 18, 4>}, {pipeline_mode = #tpu.pipeline_mode<synchronous>, transform_indices = @transform_3, window_bounds = array<i64: 128, 36>}, {pipeline_mode = #tpu.pipeline_mode<synchronous>, transform_indices = @transform_4, window_bounds = array<i64: 128, 1>}, {transform_indices = @transform_5, window_bounds = array<i64: 1, 8, 128>}, {transform_indices = @transform_6, window_bounds = array<i64: 1, 1, 128, 1>}, {transform_indices = @transform_7, window_bounds = array<i64: 1, 1, 128, 1>}]} {
    %c0 = arith.constant 0 : index
    %c0_0 = arith.constant 0 : index
    %c0_1 = arith.constant 0 : index
    %c0_2 = arith.constant 0 : index
    %0 = vector.load %arg2[%c0, %c0_0, %c0_1, %c0_2] : memref<1x8x18x4xf32, #tpu.memory_space<vmem>>, vector<1x8x18x4xf32>
    %1 = vector.shape_cast %0 : vector<1x8x18x4xf32> to vector<8x18x4xf32>
    %c0_3 = arith.constant 0 : index
    %c0_4 = arith.constant 0 : index
    %c0_5 = arith.constant 0 : index
    %c0_6 = arith.constant 0 : index
    %2 = vector.load %arg3[%c0_3, %c0_4, %c0_5, %c0_6] : memref<1x1x18x4xf32, #tpu.memory_space<vmem>>, vector<1x1x18x4xf32>
    %3 = vector.shape_cast %2 : vector<1x1x18x4xf32> to vector<1x18x4xf32>
    %c0_7 = arith.constant 0 : index
    %c0_8 = arith.constant 0 : index
    %c0_9 = arith.constant 0 : index
    %c0_10 = arith.constant 0 : index
    %4 = vector.load %arg4[%c0_7, %c0_8, %c0_9, %c0_10] : memref<1x1x18x4xf32, #tpu.memory_space<vmem>>, vector<1x1x18x4xf32>
    %5 = vector.shape_cast %4 : vector<1x1x18x4xf32> to vector<1x18x4xf32>
    %6 = tpu.concatenate %1, %3, %5 in 0 : vector<8x18x4xf32>, vector<1x18x4xf32>, vector<1x18x4xf32> -> vector<10x18x4xf32>
    %7 = vector.extract_strided_slice %6 {offsets = [0, 0, 0], sizes = [8, 16, 4], strides = [1, 1, 1]} : vector<10x18x4xf32> to vector<8x16x4xf32>
    %8 = vector.extract_strided_slice %6 {offsets = [0, 1, 0], sizes = [8, 16, 4], strides = [1, 1, 1]} : vector<10x18x4xf32> to vector<8x16x4xf32>
    %9 = vector.extract_strided_slice %6 {offsets = [0, 2, 0], sizes = [8, 16, 4], strides = [1, 1, 1]} : vector<10x18x4xf32> to vector<8x16x4xf32>
    %10 = vector.extract_strided_slice %6 {offsets = [1, 0, 0], sizes = [8, 16, 4], strides = [1, 1, 1]} : vector<10x18x4xf32> to vector<8x16x4xf32>
    %11 = vector.extract_strided_slice %6 {offsets = [1, 1, 0], sizes = [8, 16, 4], strides = [1, 1, 1]} : vector<10x18x4xf32> to vector<8x16x4xf32>
    %12 = vector.extract_strided_slice %6 {offsets = [1, 2, 0], sizes = [8, 16, 4], strides = [1, 1, 1]} : vector<10x18x4xf32> to vector<8x16x4xf32>
    %13 = vector.extract_strided_slice %6 {offsets = [2, 0, 0], sizes = [8, 16, 4], strides = [1, 1, 1]} : vector<10x18x4xf32> to vector<8x16x4xf32>
    %14 = vector.extract_strided_slice %6 {offsets = [2, 1, 0], sizes = [8, 16, 4], strides = [1, 1, 1]} : vector<10x18x4xf32> to vector<8x16x4xf32>
    %15 = vector.extract_strided_slice %6 {offsets = [2, 2, 0], sizes = [8, 16, 4], strides = [1, 1, 1]} : vector<10x18x4xf32> to vector<8x16x4xf32>
    %16 = tpu.concatenate %7, %8, %9, %10, %11, %12, %13, %14, %15 in 2 : vector<8x16x4xf32>, vector<8x16x4xf32>, vector<8x16x4xf32>, vector<8x16x4xf32>, vector<8x16x4xf32>, vector<8x16x4xf32>, vector<8x16x4xf32>, vector<8x16x4xf32>, vector<8x16x4xf32> -> vector<8x16x36xf32>
    %17 = vector.shape_cast %16 : vector<8x16x36xf32> to vector<128x36xf32>
    %c0_11 = arith.constant 0 : index
    %c0_12 = arith.constant 0 : index
    %18 = vector.load %arg5[%c0_11, %c0_12] : memref<128x36xf32, #tpu.memory_space<vmem>>, vector<128x36xf32>
    %cst = arith.constant dense<0.000000e+00> : vector<128x128xf32>
    %19 = tpu.matmul %18, %17, %cst {dimension_numbers = #tpu.dot_dimension_numbers<[1], [1], [0], [0], [0, 0, 1, 0], [], []>} : vector<128x36xf32>, vector<128x36xf32>, vector<128x128xf32> -> vector<128x128xf32>
    %c0_13 = arith.constant 0 : index
    %c0_14 = arith.constant 0 : index
    %20 = vector.load %arg6[%c0_13, %c0_14] : memref<128x1xf32, #tpu.memory_space<vmem>>, vector<128x1xf32>
    %21 = vector.broadcast %20 : vector<128x1xf32> to vector<128x128xf32>
    %22 = arith.addf %19, %21 : vector<128x128xf32>
    %cst_15 = arith.constant dense<0.000000e+00> : vector<128xf32>
    %23 = vector.multi_reduction <add>, %22, %cst_15 [1] : vector<128x128xf32> to vector<128xf32>
    %24 = vector.shape_cast %23 : vector<128xf32> to vector<128x1xf32>
    %c0_16 = arith.constant 0 : index
    %c0_17 = arith.constant 0 : index
    %c0_18 = arith.constant 0 : index
    %c0_19 = arith.constant 0 : index
    %25 = vector.load %arg8[%c0_16, %c0_17, %c0_18, %c0_19] : memref<1x1x128x1xf32, #tpu.memory_space<vmem>>, vector<1x1x128x1xf32>
    %26 = vector.shape_cast %25 : vector<1x1x128x1xf32> to vector<128x1xf32>
    %27 = vector.shape_cast %24 : vector<128x1xf32> to vector<1x1x128x1xf32>
    tpu.vector_store %arg8[%c0_16, %c0_17, %c0_18, %c0_19], %27 {strides = array<i32>} : memref<1x1x128x1xf32, #tpu.memory_space<vmem>>, vector<1x1x128x1xf32>,
    %28 = arith.mulf %22, %22 : vector<128x128xf32>
    %cst_20 = arith.constant dense<0.000000e+00> : vector<128xf32>
    %29 = vector.multi_reduction <add>, %28, %cst_20 [1] : vector<128x128xf32> to vector<128xf32>
    %30 = vector.shape_cast %29 : vector<128xf32> to vector<128x1xf32>
    %c0_21 = arith.constant 0 : index
    %c0_22 = arith.constant 0 : index
    %c0_23 = arith.constant 0 : index
    %c0_24 = arith.constant 0 : index
    %31 = vector.load %arg9[%c0_21, %c0_22, %c0_23, %c0_24] : memref<1x1x128x1xf32, #tpu.memory_space<vmem>>, vector<1x1x128x1xf32>
    %32 = vector.shape_cast %31 : vector<1x1x128x1xf32> to vector<128x1xf32>
    %33 = vector.shape_cast %30 : vector<128x1xf32> to vector<1x1x128x1xf32>
    tpu.vector_store %arg9[%c0_21, %c0_22, %c0_23, %c0_24], %33 {strides = array<i32>} : memref<1x1x128x1xf32, #tpu.memory_space<vmem>>, vector<1x1x128x1xf32>,
    %34 = vector.extract_strided_slice %22 {offsets = [0, 0], sizes = [8, 128], strides = [1, 1]} : vector<128x128xf32> to vector<8x128xf32>
    %c0_25 = arith.constant 0 : index
    %c0_26 = arith.constant 0 : index
    %c0_27 = arith.constant 0 : index
    %35 = vector.load %arg7[%c0_25, %c0_26, %c0_27] : memref<1x8x128xf32, #tpu.memory_space<vmem>>, vector<1x8x128xf32>
    %36 = vector.shape_cast %35 : vector<1x8x128xf32> to vector<8x128xf32>
    %37 = vector.shape_cast %34 : vector<8x128xf32> to vector<1x8x128xf32>
    tpu.vector_store %arg7[%c0_25, %c0_26, %c0_27], %37 {strides = array<i32>} : memref<1x8x128xf32, #tpu.memory_space<vmem>>, vector<1x8x128xf32>,
    return
  }
  func.func @transform_0(%arg0: i32, %arg1: i32) -> (i32, i32, i32, i32) {
    %c0_i32 = arith.constant 0 : i32
    %c0_i32_0 = arith.constant 0 : i32
    %c0_i32_1 = arith.constant 0 : i32
    return %arg0, %arg1, %c0_i32, %c0_i32_0 : i32, i32, i32, i32
  }
  func.func @transform_1(%arg0: i32, %arg1: i32) -> (i32, i32, i32, i32) {
    %c1_i32 = arith.constant 1 : i32
    %0 = arith.addi %arg1, %c1_i32 : i32
    %c8_i32 = arith.constant 8 : i32
    %1 = arith.muli %0, %c8_i32 : i32
    %c0_i32 = arith.constant 0 : i32
    %c0_i32_0 = arith.constant 0 : i32
    %c0_i32_1 = arith.constant 0 : i32
    return %arg0, %1, %c0_i32, %c0_i32_0 : i32, i32, i32, i32
  }
  func.func @transform_2(%arg0: i32, %arg1: i32) -> (i32, i32, i32, i32) {
    %c1_i32 = arith.constant 1 : i32
    %0 = arith.addi %arg1, %c1_i32 : i32
    %c8_i32 = arith.constant 8 : i32
    %1 = arith.muli %0, %c8_i32 : i32
    %c1_i32_0 = arith.constant 1 : i32
    %2 = arith.addi %1, %c1_i32_0 : i32
    %c0_i32 = arith.constant 0 : i32
    %c0_i32_1 = arith.constant 0 : i32
    %c0_i32_2 = arith.constant 0 : i32
    return %arg0, %2, %c0_i32, %c0_i32_1 : i32, i32, i32, i32
  }
  func.func @transform_3(%arg0: i32, %arg1: i32) -> (i32, i32) {
    %c0_i32 = arith.constant 0 : i32
    %c0_i32_0 = arith.constant 0 : i32
    %c0_i32_1 = arith.constant 0 : i32
    return %c0_i32, %c0_i32_0 : i32, i32
  }
  func.func @transform_4(%arg0: i32, %arg1: i32) -> (i32, i32) {
    %c0_i32 = arith.constant 0 : i32
    %c0_i32_0 = arith.constant 0 : i32
    %c0_i32_1 = arith.constant 0 : i32
    return %c0_i32, %c0_i32_0 : i32, i32
  }
  func.func @transform_5(%arg0: i32, %arg1: i32) -> (i32, i32, i32) {
    %c0_i32 = arith.constant 0 : i32
    %c0_i32_0 = arith.constant 0 : i32
    return %arg0, %c0_i32, %arg1 : i32, i32, i32
  }
  func.func @transform_6(%arg0: i32, %arg1: i32) -> (i32, i32, i32, i32) {
    %c0_i32 = arith.constant 0 : i32
    %c0_i32_0 = arith.constant 0 : i32
    %c0_i32_1 = arith.constant 0 : i32
    return %arg0, %arg1, %c0_i32, %c0_i32_0 : i32, i32, i32, i32
  }
  func.func @transform_7(%arg0: i32, %arg1: i32) -> (i32, i32, i32, i32) {
    %c0_i32 = arith.constant 0 : i32
    %c0_i32_0 = arith.constant 0 : i32
    %c0_i32_1 = arith.constant 0 : i32
    return %arg0, %arg1, %c0_i32, %c0_i32_0 : i32, i32, i32, i32
  }
}

module attributes {stable_mosaic.version = 11 : i64} {
  func.func @_bn_relu_kernel(%arg0: i32, %arg1: i32, %arg2: memref<1x8x256xf32, #tpu.memory_space<vmem>>, %arg3: memref<8x1xf32, #tpu.memory_space<vmem>>, %arg4: memref<8x1xf32, #tpu.memory_space<vmem>>, %arg5: memref<1x8x256xf32, #tpu.memory_space<vmem>>) attributes {dimension_semantics = [#tpu.dimension_semantics<parallel>, #tpu.dimension_semantics<parallel>], iteration_bounds = array<i64: 2, 1>, scalar_prefetch = 0 : i64, scratch_operands = 0 : i64, tpu.core_type = #tpu.core_type<tc>, window_params = [{transform_indices = @transform_0, window_bounds = array<i64: 1, 8, 256>}, {pipeline_mode = #tpu.pipeline_mode<synchronous>, transform_indices = @transform_1, window_bounds = array<i64: 8, 1>}, {pipeline_mode = #tpu.pipeline_mode<synchronous>, transform_indices = @transform_2, window_bounds = array<i64: 8, 1>}, {transform_indices = @transform_3, window_bounds = array<i64: 1, 8, 256>}]} {
    %c0 = arith.constant 0 : index
    %c0_0 = arith.constant 0 : index
    %c0_1 = arith.constant 0 : index
    %0 = vector.load %arg2[%c0, %c0_0, %c0_1] : memref<1x8x256xf32, #tpu.memory_space<vmem>>, vector<1x8x256xf32>
    %1 = vector.shape_cast %0 : vector<1x8x256xf32> to vector<8x256xf32>
    %c0_2 = arith.constant 0 : index
    %c0_3 = arith.constant 0 : index
    %2 = vector.load %arg3[%c0_2, %c0_3] : memref<8x1xf32, #tpu.memory_space<vmem>>, vector<8x1xf32>
    %3 = vector.broadcast %2 : vector<8x1xf32> to vector<8x256xf32>
    %4 = arith.mulf %1, %3 : vector<8x256xf32>
    %c0_4 = arith.constant 0 : index
    %c0_5 = arith.constant 0 : index
    %5 = vector.load %arg4[%c0_4, %c0_5] : memref<8x1xf32, #tpu.memory_space<vmem>>, vector<8x1xf32>
    %6 = vector.broadcast %5 : vector<8x1xf32> to vector<8x256xf32>
    %7 = arith.addf %4, %6 : vector<8x256xf32>
    %cst = arith.constant 0.000000e+00 : f32
    %8 = vector.broadcast %cst : f32 to vector<8x256xf32>
    %9 = arith.maximumf %7, %8 : vector<8x256xf32>
    %c0_6 = arith.constant 0 : index
    %c0_7 = arith.constant 0 : index
    %c0_8 = arith.constant 0 : index
    %10 = vector.load %arg5[%c0_6, %c0_7, %c0_8] : memref<1x8x256xf32, #tpu.memory_space<vmem>>, vector<1x8x256xf32>
    %11 = vector.shape_cast %10 : vector<1x8x256xf32> to vector<8x256xf32>
    %12 = vector.shape_cast %9 : vector<8x256xf32> to vector<1x8x256xf32>
    tpu.vector_store %arg5[%c0_6, %c0_7, %c0_8], %12 {strides = array<i32>} : memref<1x8x256xf32, #tpu.memory_space<vmem>>, vector<1x8x256xf32>,
    return
  }
  func.func @transform_0(%arg0: i32, %arg1: i32) -> (i32, i32, i32) {
    %c0_i32 = arith.constant 0 : i32
    %c0_i32_0 = arith.constant 0 : i32
    return %arg0, %c0_i32, %arg1 : i32, i32, i32
  }
  func.func @transform_1(%arg0: i32, %arg1: i32) -> (i32, i32) {
    %c0_i32 = arith.constant 0 : i32
    %c0_i32_0 = arith.constant 0 : i32
    %c0_i32_1 = arith.constant 0 : i32
    return %c0_i32, %c0_i32_0 : i32, i32
  }
  func.func @transform_2(%arg0: i32, %arg1: i32) -> (i32, i32) {
    %c0_i32 = arith.constant 0 : i32
    %c0_i32_0 = arith.constant 0 : i32
    %c0_i32_1 = arith.constant 0 : i32
    return %c0_i32, %c0_i32_0 : i32, i32
  }
  func.func @transform_3(%arg0: i32, %arg1: i32) -> (i32, i32, i32) {
    %c0_i32 = arith.constant 0 : i32
    %c0_i32_0 = arith.constant 0 : i32
    return %arg0, %c0_i32, %arg1 : i32, i32, i32
  }
}

</mosaic_0001>

<bundles_post_ra>
// kernel: convolution_forward.3
= control target key start
LH: loop header
LB: loop body
LE: loop exit
PB: predicated region body
PF: predicated region fallthrough
CT: control target
= control target key end

     0   :  { %s403_s12 = smov 0   ;;  %s405_s13 = smov 0   ;;  %s442_s0 = inlined_call_operand.vmem [shape: f32[2,8,256], index: 0, kind: input, shape index: {}]   ;;  %s443_s1 = inlined_call_operand.vmem [shape: f32[8,1], index: 1, kind: input, shape index: {}]   ;;  %s444_s2 = inlined_call_operand.vmem [shape: f32[8,1], index: 2, kind: input, shape index: {}]   ;;  %s445_s3 = inlined_call_operand.vmem [shape: f32[2,8,256], index: 3, kind: output, shape index: {}]  }
   0x1   :  { %s407_s14 = smov 0  }
   0x2 LB: > { %s25_s15 = sadd.s32 1, %s376_s13  ;;  %p323_p0 = scmp.ge.s32.totalorder %s380_s14, 1  ;;  %s380_s14 = sphi %s407_s14, %s13_s14   ;;  %s376_s13 = sphi %s405_s13, %s447_s13   ;;  %s372_s12 = sphi %s403_s12, %s446_s12  }
   0x3   : > { %p27_p1 = scmp.ge.s32.totalorder %s25_s15, 2  ;;  %p158_p2 = scmp.lt.s32.totalorder %s380_s14, 3 }
   0x5   : > { %s449_s15 = smov (%p27_p1, %s25_s15), 0  ;;  %p159_p3 = pnand %p323_p0, %p158_p2 }
   0x6   : > { %v212_v0 = vld [vmem:[%s443_s1] sm:$0xff] (!%p159_p3)  ;;  %v382_v1 = vmov (!%p159_p3), 0   ;;  %p191_p4 = scmp.lt.s32.totalorder (!%p159_p3), %s372_s12, 1 }
   0x7   : > { %162 = sbr.rel (%p159_p3) target bundleno = 145 (0x91), region = 32  ;;  %357 = vset.pattern.permute.xlu0 (!%p159_p3), %v382_v1  ;;  %v220_v2 = vld [vmem:[%s444_s2] sm:$0xff] (!%p159_p3) }
   0x8   : > { %215 = vperm.xlu0 (!%p159_p3), %357, %v212_v0  }
   0xc   : > { %223 = vperm.xlu0 (!%p159_p3), %357, %v220_v2  }
   0xe   : > { %s451_s12 = smov (!%p191_p4, %s372_s12), 1 }
   0xf   : > { %s330_s20 = sshll.u32 %s451_s12, 4 }
  0x10   : > { %s198_s23 = scalar_lea.vmem %s442_s0, %s330_s20  ;;  %s208_s26 = scalar_lea.vmem %s445_s3, %s330_s20 }
  0x11   : > { %v210_v4 = vld [vmem:[%s198_s23] sm:$0xff]  ;;  %v211_v5 = vld [vmem:[%s198_s23 + $0x8] sm:$0xff] }
  0x87   : > { %v216_v3 = vpop.permute.xlu0 %215 }
  0x88   : > { %v218_v6 = vmul.f32 %v216_v3, %v210_v4  ;;  %v219_v7 = vmul.f32 %v216_v3, %v211_v5 }
  0x8b   : > { %v224_v8 = vpop.permute.xlu0 %223 }
  0x8c   : > { %v226_v9 = vadd.f32 %v224_v8, %v218_v6  ;;  %v227_v10 = vadd.f32 %v224_v8, %v219_v7 }
  0x8e   : > { %v228_v11 = vmax.f32 %v226_v9, 0.0  ;;  %v229_v12 = vmax.f32 %v227_v10, 0.0 }
  0x90   : > { %230 = vst [vmem:[%s208_s26] sm:$0xff] %v228_v11  ;;  %231 = vst [vmem:[%s208_s26 + $0x8] sm:$0xff] %v229_v12 }
  0x91 PF: > { %s13_s14 = sadd.s32 1, %s380_s14   ;;  %s446_s12 = smov %s376_s13 }
  0x92   : > { %p10_p5 = scmp.ge.s32.totalorder %s13_s14, 4   ;;  %s447_s13 = smov %s449_s15 }
  0x94   :  { %12 = sbr.rel (!%p10_p5) target bundleno = 2 (0x2), region = 62 }

// kernel: convolution_forward.2
= control target key start
LH: loop header
LB: loop body
LE: loop exit
PB: predicated region body
PF: predicated region fallthrough
CT: control target
= control target key end

     0   :  { %s2566_s24 = smov 0   ;;  %s2568_s25 = smov 0   ;;  %s3382_s0 = inlined_call_operand.vmem [shape: f32[2,18,18,4], index: 0, kind: input, shape index: {}, may-alias: {0,1,2}]   ;;  %s3383_s1 = inlined_call_operand.vmem [shape: f32[2,18,18,4], index: 1, kind: input, shape index: {}, may-alias: {0,1,2}]   ;;  %s3384_s2 = inlined_call_operand.vmem [shape: f32[2,18,18,4], index: 2, kind: input, shape index: {}, may-alias: {0,1,2}]   ;;  %s3385_s3 = inlined_call_operand.vmem [shape: f32[128,36], index: 3, kind: input, shape index: {}]   ;;  %s3386_s4 = inlined_call_operand.vmem [shape: f32[128,1], index: 4, kind: input, shape index: {}]   ;;  %s3387_s5 = inlined_call_operand.vmem [shape: f32[2,8,256], index: 5, kind: output, shape index: {0}]   ;;  %s3388_s6 = inlined_call_operand.vmem [shape: f32[2,2,128,1], index: 6, kind: output, shape index: {1}]   ;;  %s3389_s7 = inlined_call_operand.vmem [shape: f32[2,2,128,1], index: 7, kind: output, shape index: {2}]  }
   0x1   :  { %s2570_s26 = smov 0   ;;  %s2572_s27 = smov 0  }
   0x2   :  { %s2574_s28 = smov 0  }
   0x3 LB: > { %s27_s29 = sadd.s32 1, %s2507_s26  ;;  %s30_s30 = sadd.s32 1, %s2511_s27  ;;  %s2515_s28 = sphi %s2574_s28, %s18_s28   ;;  %s2511_s27 = sphi %s2572_s27, %s3395_s27   ;;  %s2507_s26 = sphi %s2570_s26, %s3394_s26   ;;  %s2503_s25 = sphi %s2568_s25, %s3393_s25   ;;  %s2499_s24 = sphi %s2566_s24, %s3392_s24  }
   0x4   : > { %p28_p0 = scmp.ge.s32.totalorder %s27_s29, 2  ;;  %p1886_p1 = scmp.ge.s32.totalorder %s2515_s28, 1 }
   0x5   : > { %p330_p2 = scmp.lt.s32.totalorder %s2515_s28, 5 }
   0x6   : > { %s3397_s29 = smov (%p28_p0, %s27_s29), 0  ;;  %s3399_s30 = smov (!%p28_p0, %s30_s30), %s2511_s27 }
   0x7   : > { %p331_p3 = pnand %p1886_p1, %p330_p2  ;;  %p32_p4 = scmp.ge.s32.totalorder %s3399_s30, 2 }
   0x8   : > { %s1887_s8 = sshll.u32 (!%p331_p3), %s2499_s24, 3  ;;  %p422_p5 = scmp.lt.s32.totalorder (!%p331_p3), %s2503_s25, 1  ;;  %vm545_vm0 = vcmask (!%p331_p3), 1046528   ;;  %vm634_vm1 = vcmask (!%p331_p3), 1045504   ;;  %vm1037_vm2 = vcmask (!%p331_p3), 31744   ;;  %vm1054_vm3 = vcmask (!%p331_p3), 64512  }
   0x9   : > { %s3401_s30 = smov (%p32_p4, %s3399_s30), 0  ;;  %334 = sbr.rel (%p331_p3) target bundleno = 701 (0x2bd), region = 40 }
   0xa   : > { %p424_p6 = scmp.lt.s32.totalorder (!%p331_p3), %s1887_s8, 17  ;;  %s2619_s17 = sadd.s32 (!%p331_p3), 8, %s1887_s8  ;;  %vm1071_vm4 = vcmask (!%p331_p3), 97280   ;;  %vm1088_vm5 = vcmask (!%p331_p3), 130048   ;;  %vm1285_vm6 = vcmask (!%p331_p3), 293888   ;;  %vm1105_vm7 = vcmask (!%p331_p3), 162816  }
   0xb   : > { %s2517_s18 = smov (!%p331_p3), 12   ;;  %p441_p7 = scmp.lt.s32.totalorder (!%p331_p3), %s2619_s17, 17  ;;  %vm1122_vm8 = vcmask (!%p331_p3), 195584   ;;  %vm1139_vm9 = vcmask (!%p331_p3), 228352   ;;  %vm1156_vm10 = vcmask (!%p331_p3), 261120   ;;  %vm2975_vm11 = vmpackc.low (!%p331_p3), %vm1285_vm6, %vm1285_vm6  ;;  %vm1559_vm12 = vcmask (!%p331_p3), 7168  }
   0xc   : > { %s452_s19 = sadd.s32 (!%p331_p3), 1, %s2619_s17  ;;  %s2518_s20 = smov (!%p331_p3), 4  }
   0xd   : > { %s2519_s21 = smov (!%p331_p3), 24   ;;  %p455_p8 = scmp.lt.s32.totalorder (!%p331_p3), %s452_s19, 17 }
   0xe   : > { %s2520_s23 = smov (!%p331_p3), 8   ;;  %s2524_s15 = smov (!%p331_p3), 28  }
   0xf   : > { %p467_p9 = scmp.lt.s32.totalorder (!%p331_p3), %s2499_s24, 1 }
  0x10   : > { %s3403_s25 = smov (!%p422_p5, %s2503_s25), 1  ;;  %s3405_s17 = smov (!%p441_p7, %s2619_s17), 17 }
  0x11   : > { %s425_s9 = scalar_select %p424_p6, %s1887_s8, 17 }
  0x12   : > { %s2602_s10 = smul.u32 54, %s3403_s25  ;;  %s2521_s8 = smov 16  }
  0x13   : > { %s2099_s11 = smul.u32 3, %s425_s9  ;;  %s3407_s19 = smov (!%p455_p8, %s452_s19), 17 }
  0x14   : > { %s2101_s22 = smul.u32 3, %s3405_s17  ;;  %s3409_s24 = smov (!%p467_p9, %s2499_s24), 1 }
  0x15   : > { %s428_s12 = sadd.s32 %s2602_s10, %s2099_s11  ;;  %s2102_s11 = smul.u32 3, %s3407_s19 }
  0x16   : > { %s1888_s13 = sshll.u32 %s428_s12, 3  ;;  %s2677_s9 = sadd.s32 %s2101_s22, %s2602_s10 }
  0x17   : > { %s2608_s16 = scalar_lea.vmem %s3382_s0, %s1888_s13  ;;  %s2522_s12 = smov 20  }
  0x18   : > { %v2611_v0 = vld [vmem:[%s2608_s16 + $0x18] sm:$0xff]  ;;  %v2614_v1 = vld [vmem:[%s2608_s16 + $0x20] sm:$0xff]  ;;  %v2624_v4 = vld [vmem:[%s2608_s16 + $0x8] sm:$0xff]  ;;  %s2523_s13 = smov 32   ;;  %s2692_s14 = sadd.s32 %s2102_s11, %s2602_s10 }
  0x19   : > { %v2617_v2 = vld [vmem:[%s2608_s16] sm:$0xff]  ;;  %v2152_v3 = vpack.i.bf16 %v2614_v1, %v2611_v0  ;;  %v493_v5 = vld [vmem:[%s2608_s16 + $0x10] sm:$0x3]  ;;  %v547_v9 = vrot.slane %v2624_v4, 1  ;;  %v2634_v12 = vld [vmem:[%s2608_s16 + $0x38] sm:$0xff]  ;;  %v636_v13 = vrot.slane %v2624_v4, 2 }
  0x1a   : > { %v546_v6 = vrot.slane %v2617_v2, 1  ;;  %v2629_v7 = vld [vmem:[%s2608_s16 + $0x30] sm:$0xff]  ;;  %v635_v8 = vrot.slane %v2617_v2, 2  ;;  %v549_v10 = vrot.slane %v493_v5, 1  ;;  %v638_v11 = vrot.slane %v493_v5, 2  ;;  %v2680_v46 = vld [vmem:[%s2608_s16 + $0x48] sm:$0xff] }
  0x1b   : > { %2153 = vrot.lane.b32.xlu1 %v2152_v3, %s2517_s18  ;;  %v2640_v14 = vpack.i.bf16 %v2634_v12, %v2629_v7  ;;  %v496_v15 = vld [vmem:[%s2608_s16 + $0x28] sm:$0x3]  ;;  %v551_v16 = vrot.slane %v2611_v0, 1  ;;  %v552_v17 = vrot.slane %v2614_v1, 1  ;;  %v640_v18 = vrot.slane %v2611_v0, 2  ;;  %v2683_v47 = vld [vmem:[%s2608_s16 + $0x50] sm:$0xff] }
  0x1c   : > { %v548_v19 = vsel %vm545_vm0, %v546_v6, %v547_v9  ;;  %v550_v20 = vsel %vm545_vm0, %v547_v9, %v549_v10  ;;  %v637_v21 = vsel %vm634_vm1, %v635_v8, %v636_v13  ;;  %v639_v22 = vsel %vm634_vm1, %v636_v13, %v638_v11  ;;  %v499_v26 = vld [vmem:[%s2608_s16 + $0x40] sm:$0x3]  ;;  %v502_v49 = vld [vmem:[%s2608_s16 + $0x58] sm:$0x3]  ;;  %v2702_v56 = vld [vmem:[%s2608_s16 + $0x90] sm:$0xff]  ;;  %s1890_s10 = sshll.u32 %s2677_s9, 3 }
  0x1d   : > { %v2162_v23 = vpack.i.bf16 %v550_v20, %v548_v19  ;;  %v553_v24 = vsel %vm545_vm0, %v551_v16, %v552_v17  ;;  %v554_v25 = vrot.slane %v496_v15, 1  ;;  %v2167_v27 = vpack.i.bf16 %v639_v22, %v637_v21  ;;  %v2709_v61 = vld [vmem:[%s2608_s16 + $0x60] sm:$0xff]  ;;  %v2719_v63 = vld [vmem:[%s2608_s16 + $0x98] sm:$0xff]  ;;  %v2723_v5 = vld [vmem:[%s2608_s16 + $0x68] sm:$0xff]  ;;  %s447_s22 = scalar_lea.vmem %s3383_s1, %s1890_s10  ;;  %s1892_s9 = sshll.u32 %s2692_s14, 3 }
  0x1e   : > { %v641_v28 = vrot.slane %v2614_v1, 2  ;;  %v643_v29 = vrot.slane %v496_v15, 2  ;;  %v556_v30 = vrot.slane %v2629_v7, 1  ;;  %v557_v32 = vrot.slane %v2634_v12, 1  ;;  %v511_v3 = vld [vmem:[%s2608_s16 + $0xa0] sm:$0x3]  ;;  %s461_s10 = scalar_lea.vmem %s3384_s2, %s1892_s9 }
  0x1f   : > { %2163 = vrot.lane.b32.xlu0 %v2162_v23, %s2518_s20  ;;  %2158 = vrot.lane.b32.xlu1 %v2640_v14, %s2519_s21  ;;  %v555_v31 = vsel %vm545_vm0, %v552_v17, %v554_v25  ;;  %v645_v33 = vrot.slane %v2629_v7, 2  ;;  %v646_v34 = vrot.slane %v2634_v12, 2  ;;  %v559_v38 = vrot.slane %v499_v26, 1  ;;  %v2731_v10 = vld [vmem:[%s2608_s16 + $0x70] sm:$0x3] }
  0x20   : > { %v2172_v35 = vpack.i.bf16 %v555_v31, %v553_v24  ;;  %v642_v36 = vsel %vm634_vm1, %v640_v18, %v641_v28  ;;  %v644_v37 = vsel %vm634_vm1, %v641_v28, %v643_v29  ;;  %v648_v40 = vrot.slane %v499_v26, 2  ;;  %v2739_v18 = vld [vmem:[%s2608_s16 + $0xa8] sm:$0xff]  ;;  %v2751_v22 = vld [vmem:[%s2608_s16 + $0xb0] sm:$0xff]  ;;  %v514_v23 = vld [vmem:[%s2608_s16 + $0xb8] sm:$0x3] }
  0x21   : > { %v647_v39 = vsel %vm634_vm1, %v645_v33, %v646_v34  ;;  %v2177_v41 = vpack.i.bf16 %v644_v37, %v642_v36  ;;  %v558_v43 = vsel %vm545_vm0, %v556_v30, %v557_v32  ;;  %v560_v44 = vsel %vm545_vm0, %v557_v32, %v559_v38  ;;  %v2775_v36 = vld [vmem:[%s447_s22] sm:$0xff] }
  0x22   : > { %v649_v42 = vsel %vm634_vm1, %v646_v34, %v648_v40  ;;  %v2686_v48 = vpack.i.bf16 %v560_v44, %v558_v43  ;;  %v561_v50 = vrot.slane %v2680_v46, 1  ;;  %v562_v51 = vrot.slane %v2683_v47, 1  ;;  %v2783_v40 = vld [vmem:[%s447_s22 + $0x8] sm:$0xff] }
  0x23   : > { %2168 = vrot.lane.b32.xlu0 %v2167_v27, %s2520_s23  ;;  %2173 = vrot.lane.b32.xlu1 %v2172_v35, %s2521_s8  ;;  %v2674_v45 = vpack.i.bf16 %v649_v42, %v647_v39  ;;  %v564_v52 = vrot.slane %v502_v49, 1  ;;  %v650_v53 = vrot.slane %v2680_v46, 2  ;;  %v651_v54 = vrot.slane %v2683_v47, 2 }
  0x24   : > { %v653_v55 = vrot.slane %v502_v49, 2  ;;  %v563_v57 = vsel %vm545_vm0, %v561_v50, %v562_v51  ;;  %v2716_v62 = vpack.i.bf16 %v2683_v47, %v2680_v46  ;;  %v576_v6 = vrot.slane %v2702_v56, 1 }
  0x25   : > { %v565_v58 = vsel %vm545_vm0, %v562_v51, %v564_v52  ;;  %v652_v59 = vsel %vm634_vm1, %v650_v53, %v651_v54  ;;  %v566_v11 = vrot.slane %v2709_v61, 1  ;;  %v577_v13 = vrot.slane %v2719_v63, 1  ;;  %v2793_v52 = vld [vmem:[%s461_s10 + $0x8] sm:$0xff] }
  0x26   : > { %v654_v60 = vsel %vm634_vm1, %v651_v54, %v653_v55  ;;  %v2726_v8 = vpack.i.bf16 %v565_v58, %v563_v57  ;;  %v579_v15 = vrot.slane %v511_v3, 1  ;;  %v665_v16 = vrot.slane %v2702_v56, 2 }
  0x27   : > { %2178 = vrot.lane.b32.xlu0 %v2177_v41, %s2522_s12  ;;  %2188 = vrot.lane.b32.xlu1 %v2674_v45, %s2523_s13  ;;  %v2728_v9 = vpack.i.bf16 %v654_v60, %v652_v59  ;;  %v666_v17 = vrot.slane %v2719_v63, 2  ;;  %v2747_v19 = vpack.i.bf16 %v2723_v5, %v2709_v61  ;;  %v567_v20 = vrot.slane %v2723_v5, 1  ;;  %v2803_v60 = vld [vmem:[%s461_s10] sm:$0xff] }
  0x28   : > { %v668_v21 = vrot.slane %v511_v3, 2  ;;  %v569_v24 = vrot.slane %v2731_v10, 1  ;;  %v578_v25 = vsel %vm545_vm0, %v576_v6, %v577_v13  ;;  %v580_v26 = vsel %vm545_vm0, %v577_v13, %v579_v15  ;;  %v520_v15 = vld [vmem:[%s461_s10 + $0x10] sm:$0x3] }
  0x29   : > { %v2762_v27 = vpack.i.bf16 %v580_v26, %v578_v25  ;;  %v581_v29 = vrot.slane %v2739_v18, 1  ;;  %v582_v31 = vrot.slane %v2751_v22, 1  ;;  %v584_v32 = vrot.slane %v514_v23, 1 }
  0x2a   : > { %v669_v28 = vsel %vm634_vm1, %v666_v17, %v668_v21  ;;  %v670_v33 = vrot.slane %v2739_v18, 2  ;;  %v671_v34 = vrot.slane %v2751_v22, 2  ;;  %v655_v37 = vrot.slane %v2709_v61, 2 }
  0x2b   : > { %2183 = vrot.lane.b32.xlu0 %v2686_v48, %s2524_s15  ;;  %2198 = vrot.lane.b32.xlu1 %v2177_v41, %s2520_s23  ;;  %v583_v38 = vsel %vm545_vm0, %v581_v29, %v582_v31  ;;  %v585_v39 = vsel %vm545_vm0, %v582_v31, %v584_v32  ;;  %v517_v41 = vld [vmem:[%s447_s22 + $0x10] sm:$0x3]  ;;  %v656_v49 = vrot.slane %v2723_v5, 2  ;;  %v774_v51 = vrot.slane %v2775_v36, 1 }
  0x2c   : > { %v2785_v42 = vpack.i.bf16 %v585_v39, %v583_v38  ;;  %v672_v43 = vsel %vm634_vm1, %v670_v33, %v671_v34  ;;  %v775_v53 = vrot.slane %v2783_v40, 1  ;;  %v777_v54 = vrot.slane %v517_v41, 1 }
  0x2d   : > { %v827_v55 = vrot.slane %v2775_v36, 2  ;;  %v828_v57 = vrot.slane %v2783_v40, 2  ;;  %v658_v58 = vrot.slane %v2731_v10, 2  ;;  %v830_v59 = vrot.slane %v517_v41, 2 }
  0x2e   : > { %v776_v3 = vsel %vm545_vm0, %v774_v51, %v775_v53  ;;  %v778_v6 = vsel %vm545_vm0, %v775_v53, %v777_v54  ;;  %v985_v21 = vrot.slane %v2793_v52, 2  ;;  %v931_v26 = vrot.slane %v2803_v60, 1 }
  0x2f   : > { %2193 = vrot.lane.b32.xlu0 %v2172_v35, %s2518_s20  ;;  %2208 = vrot.lane.b32.xlu1 %v2686_v48, %s2521_s8  ;;  %v673_v35 = vrot.slane %v514_v23, 2  ;;  %v829_v13 = vsel %vm634_vm1, %v827_v55, %v828_v57  ;;  %v657_v23 = vsel %vm634_vm1, %v655_v37, %v656_v49  ;;  %v934_v29 = vrot.slane %v520_v15, 1 }
  0x30   : > { %v987_v31 = vrot.slane %v520_v15, 2  ;;  %v568_v39 = vsel %vm545_vm0, %v566_v11, %v567_v20 }
  0x31   : > { %v674_v44 = vsel %vm634_vm1, %v671_v34, %v673_v35 }
  0x32   : > { %v2790_v50 = vpack.i.bf16 %v674_v44, %v672_v43  ;;  %v2833_v34 = vsel %vm634_vm1, %v985_v21, %v987_v31  ;;  %v2857_v43 = vld [vmem:[%s2608_s16 + $0x78] sm:$0xff]  ;;  %v2860_v44 = vld [vmem:[%s2608_s16 + $0x80] sm:$0xff] }
  0x33   : > { %2203 = vrot.lane.b32.xlu0 %v2640_v14, %s2517_s18  ;;  %2218 = vrot.lane.b32.xlu1 %v2716_v62, %s2519_s21  ;;  %v667_v14 = vsel %vm634_vm1, %v665_v16, %v666_v17  ;;  %v2809_v16 = vpack.i.bf16 %v778_v6, %v776_v3  ;;  %v831_v17 = vsel %vm634_vm1, %v828_v57, %v830_v59  ;;  %v660_v10 = vrot.slane %v2857_v43, 2  ;;  %v1173_v6 = vld [vmem:[%s3385_s3] sm:$0xff] }
  0x34   : > { %v2766_v30 = vpack.i.bf16 %v669_v28, %v667_v14  ;;  %v2818_v25 = vpack.i.bf16 %v831_v17, %v829_v13  ;;  %v659_v14 = vsel %vm634_vm1, %v656_v49, %v658_v58  ;;  %v984_v28 = vrot.slane %v2803_v60, 2  ;;  %v508_v49 = vld [vmem:[%s2608_s16 + $0x88] sm:$0x3]  ;;  %2011 = vmatprep.mubr.msk.f32.mxu0 %vm1285_vm6, %v1173_v6 }
  0x35   : > { %v2267_v35 = vpack.i.bf16 %v659_v14, %v657_v23  ;;  %v661_v11 = vrot.slane %v2860_v44, 2  ;;  %v571_v51 = vrot.slane %v2857_v43, 1  ;;  %v572_v53 = vrot.slane %v2860_v44, 1 }
  0x36   : > { %v2830_v33 = vsel %vm634_vm1, %v984_v28, %v985_v21  ;;  %v574_v54 = vrot.slane %v508_v49, 1 }
  0x37   : > { %2213 = vrot.lane.b32.xlu0 %v2674_v45, %s2522_s12  ;;  %2228 = vrot.lane.b32.xlu1 %v2728_v9, %s2523_s13  ;;  %v2467_v38 = vpack.i.bf16 %v2833_v34, %v2830_v33  ;;  %v573_v57 = vsel %vm545_vm0, %v571_v51, %v572_v53 }
  0x38   : > { %v575_v58 = vsel %vm545_vm0, %v572_v53, %v574_v54 }
  0x39   : > { %v2302_v59 = vpack.i.bf16 %v575_v58, %v573_v57 }
  0x3b   : > { %2223 = vrot.lane.b32.xlu0 %v2726_v8, %s2524_s15  ;;  %2238 = vrot.lane.b32.xlu1 %v2674_v45, %s2520_s23  ;;  %v932_v45 = vrot.slane %v2793_v52, 1 }
  0x3d   : > { %v2824_v32 = vsel %vm545_vm0, %v931_v26, %v932_v45 }
  0x3f   : > { %2233 = vrot.lane.b32.xlu0 %v2686_v48, %s2518_s20  ;;  %2248 = vrot.lane.b32.xlu1 %v2726_v8, %s2521_s8  ;;  %v2827_v48 = vsel %vm545_vm0, %v932_v45, %v934_v29 }
  0x40   : > { %v2462_v37 = vpack.i.bf16 %v2827_v48, %v2824_v32 }
  0x43   : > { %2243 = vrot.lane.b32.xlu0 %v2716_v62, %s2517_s18  ;;  %2258 = vrot.lane.b32.xlu1 %v2747_v19, %s2519_s21  ;;  %v570_v62 = vsel %vm545_vm0, %v567_v20, %v569_v24  ;;  %v663_v20 = vrot.slane %v508_v49, 2  ;;  %v2297_v24 = vpack.i.bf16 %v2860_v44, %v2857_v43 }
  0x44   : > { %v2262_v41 = vpack.i.bf16 %v570_v62, %v568_v39 }
  0x45   : > { %v664_v55 = vsel %vm634_vm1, %v661_v11, %v663_v20 }
  0x47   : > { %2253 = vrot.lane.b32.xlu0 %v2728_v9, %s2522_s12  ;;  %2268 = vrot.lane.b32.xlu1 %v2267_v35, %s2523_s13 }
  0x4b   : > { %2263 = vrot.lane.b32.xlu0 %v2262_v41, %s2524_s15  ;;  %2278 = vrot.lane.b32.xlu1 %v2728_v9, %s2520_s23  ;;  %v662_v9 = vsel %vm634_vm1, %v660_v10, %v661_v11 }
  0x4f   : > { %2273 = vrot.lane.b32.xlu0 %v2726_v8, %s2518_s20  ;;  %2288 = vrot.lane.b32.xlu1 %v2262_v41, %s2521_s8  ;;  %v2307_v8 = vpack.i.bf16 %v664_v55, %v662_v9  ;;  %v1176_v55 = vld [vmem:[%s3385_s3 + $0x18] sm:$0xff] }
  0x53   : > { %2283 = vrot.lane.b32.xlu0 %v2747_v19, %s2517_s18  ;;  %2298 = vrot.lane.b32.xlu1 %v2297_v24, %s2519_s21  ;;  %v2337_v19 = vpack.i.bf16 %v2719_v63, %v2702_v56  ;;  %v2377_v56 = vpack.i.bf16 %v2751_v22, %v2739_v18  ;;  %v2417_v18 = vpack.i.bf16 %v2783_v40, %v2775_v36 }
  0x57   : > { %2293 = vrot.lane.b32.xlu0 %v2267_v35, %s2522_s12  ;;  %2308 = vrot.lane.b32.xlu1 %v2307_v8, %s2523_s13 }
  0x5b   : > { %2303 = vrot.lane.b32.xlu0 %v2302_v59, %s2524_s15  ;;  %2318 = vrot.lane.b32.xlu1 %v2267_v35, %s2520_s23 }
  0x5f   : > { %2313 = vrot.lane.b32.xlu0 %v2262_v41, %s2518_s20  ;;  %2328 = vrot.lane.b32.xlu1 %v2302_v59, %s2521_s8 }
  0x63   : > { %2323 = vrot.lane.b32.xlu0 %v2297_v24, %s2517_s18  ;;  %2338 = vrot.lane.b32.xlu1 %v2337_v19, %s2519_s21 }
  0x67   : > { %2333 = vrot.lane.b32.xlu0 %v2307_v8, %s2522_s12  ;;  %2348 = vrot.lane.b32.xlu1 %v2766_v30, %s2523_s13 }
  0x6b   : > { %2343 = vrot.lane.b32.xlu0 %v2762_v27, %s2524_s15  ;;  %2358 = vrot.lane.b32.xlu1 %v2307_v8, %s2520_s23 }
  0x6f   : > { %2353 = vrot.lane.b32.xlu0 %v2302_v59, %s2518_s20  ;;  %2368 = vrot.lane.b32.xlu1 %v2762_v27, %s2521_s8 }
  0x73   : > { %2363 = vrot.lane.b32.xlu0 %v2337_v19, %s2517_s18  ;;  %2378 = vrot.lane.b32.xlu1 %v2377_v56, %s2519_s21 }
  0x77   : > { %2373 = vrot.lane.b32.xlu0 %v2766_v30, %s2522_s12  ;;  %2388 = vrot.lane.b32.xlu1 %v2790_v50, %s2523_s13 }
  0x7b   : > { %2383 = vrot.lane.b32.xlu0 %v2785_v42, %s2524_s15  ;;  %2398 = vrot.lane.b32.xlu1 %v2766_v30, %s2520_s23 }
  0x7f   : > { %2393 = vrot.lane.b32.xlu0 %v2762_v27, %s2518_s20  ;;  %2408 = vrot.lane.b32.xlu1 %v2785_v42, %s2521_s8  ;;  %v2457_v27 = vpack.i.bf16 %v2793_v52, %v2803_v60  ;;  %v1181_v52 = vld [vmem:[%s3385_s3 + $0x40] sm:$0xff] }
  0x80   : > { %2023 = vmatprep.mubr.msk.f32.mxu1 %vm1285_vm6, %v1181_v52  ;;  %v1189_v52 = vld [vmem:[%s3386_s4] sm:$0xff] }
  0x83   : > { %2403 = vrot.lane.b32.xlu0 %v2377_v56, %s2517_s18  ;;  %2418 = vrot.lane.b32.xlu1 %v2417_v18, %s2519_s21 }
  0x87   : > { %2413 = vrot.lane.b32.xlu0 %v2790_v50, %s2522_s12  ;;  %2428 = vrot.lane.b32.xlu1 %v2818_v25, %s2523_s13 }
  0x8b   : > { %2423 = vrot.lane.b32.xlu0 %v2809_v16, %s2524_s15  ;;  %2438 = vrot.lane.b32.xlu1 %v2790_v50, %s2520_s23 }
  0x8d   : > { %v2154_v22 = vpop.permute.xlu1 %2153 }
  0x8e   : > { %v2155_v17 = vunpack.i.l.bf16 %v2154_v22 }
  0x8f   : > { %2433 = vrot.lane.b32.xlu0 %v2785_v42, %s2518_s20  ;;  %2448 = vrot.lane.b32.xlu1 %v2809_v16, %s2521_s8  ;;  %v2156_v16 = vunpack.i.h.bf16 %v2154_v22  ;;  %s1893_s8 = sshll.u32 %s3403_s25, 1 }
  0x90   : > { %s470_s17 = sadd.s32 %s1893_s8, %s3409_s24 }
  0x91   : > { %v2164_v30 = vpop.permute.xlu0 %2163  ;;  %v2159_v36 = vpop.permute.xlu1 %2158 }
  0x92   : > { %v2166_v40 = vunpack.i.h.bf16 %v2164_v30  ;;  %v2165_v3 = vunpack.i.l.bf16 %v2164_v30  ;;  %v2160_v62 = vunpack.i.l.bf16 %v2159_v36 }
  0x93   : > { %2443 = vrot.lane.b32.xlu0 %v2417_v18, %s2517_s18  ;;  %2458 = vrot.lane.b32.xlu1 %v2457_v27, %s2519_s21  ;;  %s1894_s18 = sshll.u32 %s470_s17, 3 }
  0x94   : > { %v1039_v21 = vsel %vm1037_vm2, %v2624_v4, %v2166_v40  ;;  %v1038_v23 = vsel %vm1037_vm2, %v2617_v2, %v2165_v3 }
  0x95   : > { %v2169_v50 = vpop.permute.xlu0 %2168  ;;  %v2174_v42 = vpop.permute.xlu1 %2173 }
  0x96   : > { %v2171_v60 = vunpack.i.h.bf16 %v2169_v50  ;;  %v2170_v13 = vunpack.i.l.bf16 %v2169_v50  ;;  %v2176_v45 = vunpack.i.h.bf16 %v2174_v42  ;;  %v2175_v15 = vunpack.i.l.bf16 %v2174_v42 }
  0x97   : > { %2453 = vrot.lane.b32.xlu0 %v2818_v25, %s2522_s12  ;;  %2468 = vrot.lane.b32.xlu1 %v2467_v38, %s2523_s13  ;;  %v2161_v38 = vunpack.i.h.bf16 %v2159_v36  ;;  %s472_s12 = scalar_lea.vmem %s3387_s5, %s1894_s18  ;;  %s1895_s13 = sshll.u32 %s3409_s24, 4 }
  0x98   : > { %v1055_v26 = vsel %vm1054_vm3, %v1038_v23, %v2170_v13  ;;  %v1056_v14 = vsel %vm1054_vm3, %v1039_v21, %v2171_v60  ;;  %v1190_v60 = vld [vmem:[%s3386_s4 + $0x8] sm:$0xff] }
  0x99   : > { %v1072_v28 = vsel %vm1071_vm4, %v1055_v26, %v2155_v17  ;;  %v1073_v29 = vsel %vm1071_vm4, %v1056_v14, %v2156_v16  ;;  %v2179_v4 = vpop.permute.xlu0 %2178  ;;  %v2189_v31 = vpop.permute.xlu1 %2188 }
  0x9a   : > { %v1089_v2 = vsel %vm1088_vm5, %v1072_v28, %v2175_v15  ;;  %v1090_v25 = vsel %vm1088_vm5, %v1073_v29, %v2176_v45  ;;  %v2181_v35 = vunpack.i.h.bf16 %v2179_v4  ;;  %v2180_v39 = vunpack.i.l.bf16 %v2179_v4  ;;  %v1192_v28 = vld [vmem:[%s3386_s4 + $0x18] sm:$0xff]  ;;  %v1191_v29 = vld [vmem:[%s3386_s4 + $0x10] sm:$0xff] }
  0x9b   : > { %2463 = vrot.lane.b32.xlu0 %v2462_v37, %s2524_s15  ;;  %v2191_v49 = vunpack.i.h.bf16 %v2189_v31  ;;  %v2190_v10 = vunpack.i.l.bf16 %v2189_v31  ;;  %v2525_v15 = vmov 0   ;;  %s1896_s15 = sshll.u32 %s3403_s25, 5 }
  0x9c   : > { %v1106_v33 = vsel %vm1105_vm7, %v1089_v2, %v2180_v39  ;;  %v1107_v34 = vsel %vm1105_vm7, %v1090_v25, %v2181_v35  ;;  %2472 = vset.pattern.permute.xlu0 %v2525_v15  ;;  %2473 = vset.pattern.permute.xlu1 %v2525_v15  ;;  %v1200_v15 = vld [vmem:[%s3386_s4 + $0x58] sm:$0xff]  ;;  %s479_s19 = sadd.s32 %s1896_s15, %s1895_s13 }
  0x9d   : > { %v2184_v41 = vpop.permute.xlu0 %2183  ;;  %v2199_v11 = vpop.permute.xlu1 %2198  ;;  %v1123_v51 = vsel %vm1122_vm8, %v1106_v33, %v2160_v62  ;;  %v1124_v32 = vsel %vm1122_vm8, %v1107_v34, %v2161_v38  ;;  %1212 = vperm.xlu1 %2473, %v1190_v60   ;;  %s1897_s22 = sshll.u32 %s479_s19, 3 }
  0x9e   : > { %v2186_v20 = vunpack.i.h.bf16 %v2184_v41  ;;  %v2185_v24 = vunpack.i.l.bf16 %v2184_v41  ;;  %v2201_v19 = vunpack.i.h.bf16 %v2199_v11  ;;  %v2200_v56 = vunpack.i.l.bf16 %v2199_v11  ;;  %v1194_v41 = vld [vmem:[%s3386_s4 + $0x28] sm:$0xff]  ;;  %s3296_s14 = scalar_lea.vmem %s3388_s6, %s1897_s22  ;;  %s3309_s10 = scalar_lea.vmem %s3389_s7, %s1897_s22 }
  0x9f   : > { %1207 = vperm.xlu0 %2472, %v1189_v52  }
  0xa0   : > { %v1140_v48 = vsel %vm1139_vm9, %v1123_v51, %v2185_v24  ;;  %v1141_v37 = vsel %vm1139_vm9, %v1124_v32, %v2186_v20 }
  0xa1   : > { %v1157_v53 = vsel %vm1156_vm10, %v1140_v48, %v2190_v10  ;;  %v1158_v54 = vsel %vm1156_vm10, %v1141_v37, %v2191_v49  ;;  %v2194_v9 = vpop.permute.xlu0 %2193  ;;  %v2209_v8 = vpop.permute.xlu1 %2208  ;;  %1217 = vperm.xlu1 %2473, %v1191_v29   ;;  %v1193_v49 = vld [vmem:[%s3386_s4 + $0x20] sm:$0xff] }
  0xa2   : > { %v2196_v57 = vunpack.i.h.bf16 %v2194_v9  ;;  %v2195_v58 = vunpack.i.l.bf16 %v2194_v9  ;;  %v2035_v59 = vpack.c.bf16 %v1158_v54, %v1157_v53  ;;  %v2211_v3 = vunpack.i.h.bf16 %v2209_v8 }
  0xa3   : > { %v2210_v50 = vunpack.i.l.bf16 %v2209_v8  ;;  %1222 = vperm.xlu0 %2472, %v1192_v28   ;;  %v1196_v8 = vld [vmem:[%s3386_s4 + $0x38] sm:$0xff] }
  0xa4   : > { %v1041_v18 = vsel %vm1037_vm2, %v2614_v1, %v2196_v57  ;;  %v1040_v22 = vsel %vm1037_vm2, %v2611_v0, %v2195_v58  ;;  %2037 = vmatprep.subr.msk.bf16.mxu0 %vm2975_vm11, %v2035_v59  ;;  %2083 = vmatprep.subr.msk.bf16.mxu1 %vm2975_vm11, %v2035_v59  ;;  %v1195_v57 = vld [vmem:[%s3386_s4 + $0x30] sm:$0xff] }
  0xa5   : > { %v2204_v27 = vpop.permute.xlu0 %2203  ;;  %2040 = vmatpush3.bf16.xpose.msk.msra.mxu0 %vm2975_vm11, %v2035_v59  ;;  %2091 = vmatpush3.bf16.xpose.msk.msra.mxu1 %vm2975_vm11, %v2035_v59  ;;  %v2219_v30 = vpop.permute.xlu1 %2218  ;;  %v1057_v1 = vsel %vm1054_vm3, %v1040_v22, %v2200_v56  ;;  %v1058_v0 = vsel %vm1054_vm3, %v1041_v18, %v2201_v19 }
  0xa6   : > { %v2206_v36 = vunpack.i.h.bf16 %v2204_v27  ;;  %v2205_v40 = vunpack.i.l.bf16 %v2204_v27  ;;  %v2221_v26 = vunpack.i.h.bf16 %v2219_v30  ;;  %v2220_v14 = vunpack.i.l.bf16 %v2219_v30  ;;  %1227 = vperm.xlu1 %2473, %v1193_v49  }
  0xa7   : > { %1232 = vperm.xlu0 %2472, %v1194_v41  }
  0xa8   : > { %v1074_v42 = vsel %vm1071_vm4, %v1057_v1, %v2205_v40  ;;  %v1075_v6 = vsel %vm1071_vm4, %v1058_v0, %v2206_v36  ;;  %v1198_v36 = vld [vmem:[%s3386_s4 + $0x48] sm:$0xff]  ;;  %v1197_v40 = vld [vmem:[%s3386_s4 + $0x40] sm:$0xff] }
  0xa9   : > { %v2214_v13 = vpop.permute.xlu0 %2213  ;;  %v2229_v45 = vpop.permute.xlu1 %2228  ;;  %v1091_v21 = vsel %vm1088_vm5, %v1074_v42, %v2210_v50  ;;  %v1092_v23 = vsel %vm1088_vm5, %v1075_v6, %v2211_v3 }
  0xaa   : > { %v2216_v16 = vunpack.i.h.bf16 %v2214_v13  ;;  %v2215_v17 = vunpack.i.l.bf16 %v2214_v13  ;;  %v2231_v25 = vunpack.i.h.bf16 %v2229_v45  ;;  %v2230_v35 = vunpack.i.l.bf16 %v2229_v45  ;;  %1237 = vperm.xlu1 %2473, %v1195_v57  }
  0xab   : > { %1242 = vperm.xlu0 %2472, %v1196_v8  }
  0xac   : > { %v1108_v4 = vsel %vm1105_vm7, %v1091_v21, %v2215_v17  ;;  %v1109_v31 = vsel %vm1105_vm7, %v1092_v23, %v2216_v16  ;;  %v1199_v16 = vld [vmem:[%s3386_s4 + $0x50] sm:$0xff] }
  0xad   : > { %v2224_v2 = vpop.permute.xlu0 %2223  ;;  %v2239_v39 = vpop.permute.xlu1 %2238  ;;  %v1125_v38 = vsel %vm1122_vm8, %v1108_v4, %v2220_v14  ;;  %v1126_v62 = vsel %vm1122_vm8, %v1109_v31, %v2221_v26 }
  0xae   : > { %v2226_v33 = vunpack.i.h.bf16 %v2224_v2  ;;  %v2225_v34 = vunpack.i.l.bf16 %v2224_v2  ;;  %v2241_v54 = vunpack.i.h.bf16 %v2239_v39  ;;  %v2240_v9 = vunpack.i.l.bf16 %v2239_v39  ;;  %1247 = vperm.xlu1 %2473, %v1197_v40  }
  0xaf   : > { %1252 = vperm.xlu0 %2472, %v1198_v36  }
  0xb0   : > { %v1142_v10 = vsel %vm1139_vm9, %v1125_v38, %v2225_v34  ;;  %v1143_v11 = vsel %vm1139_vm9, %v1126_v62, %v2226_v33 }
  0xb1   : > { %v1159_v20 = vsel %vm1156_vm10, %v1142_v10, %v2230_v35  ;;  %v1160_v24 = vsel %vm1156_vm10, %v1143_v11, %v2231_v25  ;;  %v2234_v51 = vpop.permute.xlu0 %2233  ;;  %v2249_v32 = vpop.permute.xlu1 %2248  ;;  %v1202_v25 = vld [vmem:[%s3386_s4 + $0x68] sm:$0xff]  ;;  %v1201_v35 = vld [vmem:[%s3386_s4 + $0x60] sm:$0xff] }
  0xb2   : > { %v2041_v48 = vpack.c.bf16 %v1160_v24, %v1159_v20  ;;  %v2236_v37 = vunpack.i.h.bf16 %v2234_v51  ;;  %v2235_v53 = vunpack.i.l.bf16 %v2234_v51  ;;  %v2251_v27 = vunpack.i.h.bf16 %v2249_v32  ;;  %1257 = vperm.xlu1 %2473, %v1199_v16   ;;  %v1204_v51 = vld [vmem:[%s3386_s4 + $0x78] sm:$0xff] }
  0xb3   : > { %v2250_v30 = vunpack.i.l.bf16 %v2249_v32  ;;  %1262 = vperm.xlu0 %2472, %v1200_v15   ;;  %v1203_v32 = vld [vmem:[%s3386_s4 + $0x70] sm:$0xff] }
  0xb4   : > { %v1043_v58 = vsel %vm1037_vm2, %v2634_v12, %v2236_v37  ;;  %v1042_v59 = vsel %vm1037_vm2, %v2629_v7, %v2235_v53  ;;  %2043 = vmatprep.subr.msk.bf16.mxu0 %vm2975_vm11, %v2041_v48  ;;  %2084 = vmatprep.subr.msk.bf16.mxu1 %vm2975_vm11, %v2041_v48 }
  0xb5   : > { %v2244_v19 = vpop.permute.xlu0 %2243  ;;  %2046 = vmatpush3.bf16.xpose.msk.msra.mxu0 %vm2975_vm11, %v2041_v48  ;;  %2092 = vmatpush3.bf16.xpose.msk.msra.mxu1 %vm2975_vm11, %v2041_v48  ;;  %v2259_v56 = vpop.permute.xlu1 %2258  ;;  %v1059_v7 = vsel %vm1054_vm3, %v1042_v59, %v2240_v9  ;;  %v1060_v12 = vsel %vm1054_vm3, %v1043_v58, %v2241_v54 }
  0xb6   : > { %v2246_v18 = vunpack.i.h.bf16 %v2244_v19  ;;  %v2245_v22 = vunpack.i.l.bf16 %v2244_v19  ;;  %v2261_v13 = vunpack.i.h.bf16 %v2259_v56  ;;  %v2260_v45 = vunpack.i.l.bf16 %v2259_v56  ;;  %1267 = vperm.xlu1 %2473, %v1201_v35  }
  0xb7   : > { %1272 = vperm.xlu0 %2472, %v1202_v25  }
  0xb8   : > { %v1076_v1 = vsel %vm1071_vm4, %v1059_v7, %v2245_v22  ;;  %v1077_v0 = vsel %vm1071_vm4, %v1060_v12, %v2246_v18 }
  0xb9   : > { %v2254_v3 = vpop.permute.xlu0 %2253  ;;  %v2269_v50 = vpop.permute.xlu1 %2268  ;;  %v1093_v52 = vsel %vm1088_vm5, %v1076_v1, %v2250_v30  ;;  %v1094_v60 = vsel %vm1088_vm5, %v1077_v0, %v2251_v27 }
  0xba   : > { %v2256_v42 = vunpack.i.h.bf16 %v2254_v3  ;;  %v2255_v6 = vunpack.i.l.bf16 %v2254_v3  ;;  %v2271_v26 = vunpack.i.h.bf16 %v2269_v50  ;;  %v2270_v14 = vunpack.i.l.bf16 %v2269_v50  ;;  %1277 = vperm.xlu1 %2473, %v1203_v32  }
  0xbb   : > { %1282 = vperm.xlu0 %2472, %v1204_v51  }
  0xbc   : > { %v1110_v17 = vsel %vm1105_vm7, %v1093_v52, %v2255_v6  ;;  %v1111_v21 = vsel %vm1105_vm7, %v1094_v60, %v2256_v42 }
  0xbd   : > { %v2264_v23 = vpop.permute.xlu0 %2263  ;;  %v2279_v28 = vpop.permute.xlu1 %2278  ;;  %v1127_v31 = vsel %vm1122_vm8, %v1110_v17, %v2260_v45  ;;  %v1128_v2 = vsel %vm1122_vm8, %v1111_v21, %v2261_v13 }
  0xbe   : > { %v2266_v29 = vunpack.i.h.bf16 %v2264_v23  ;;  %v2265_v4 = vunpack.i.l.bf16 %v2264_v23  ;;  %v2281_v20 = vunpack.i.h.bf16 %v2279_v28  ;;  %v2280_v24 = vunpack.i.l.bf16 %v2279_v28 }
  0xc0   : > { %v1144_v39 = vsel %vm1139_vm9, %v1127_v31, %v2265_v4  ;;  %v1145_v33 = vsel %vm1139_vm9, %v1128_v2, %v2266_v29 }
  0xc1   : > { %v1161_v34 = vsel %vm1156_vm10, %v1144_v39, %v2270_v14  ;;  %v1162_v38 = vsel %vm1156_vm10, %v1145_v33, %v2271_v26  ;;  %v2274_v62 = vpop.permute.xlu0 %2273  ;;  %v2289_v41 = vpop.permute.xlu1 %2288 }
  0xc2   : > { %v2047_v49 = vpack.c.bf16 %v1162_v38, %v1161_v34  ;;  %v2276_v10 = vunpack.i.h.bf16 %v2274_v62  ;;  %v2275_v11 = vunpack.i.l.bf16 %v2274_v62  ;;  %v2291_v57 = vunpack.i.h.bf16 %v2289_v41 }
  0xc3   : > { %v2290_v58 = vunpack.i.l.bf16 %v2289_v41 }
  0xc4   : > { %v1045_v48 = vsel %vm1037_vm2, %v2683_v47, %v2276_v10  ;;  %v1044_v37 = vsel %vm1037_vm2, %v2680_v46, %v2275_v11  ;;  %2049 = vmatprep.subr.msk.bf16.mxu0 %vm2975_vm11, %v2047_v49  ;;  %2085 = vmatprep.subr.msk.bf16.mxu1 %vm2975_vm11, %v2047_v49 }
  0xc5   : > { %v2284_v53 = vpop.permute.xlu0 %2283  ;;  %2052 = vmatpush3.bf16.xpose.msk.msra.mxu0 %vm2975_vm11, %v2047_v49  ;;  %2093 = vmatpush3.bf16.xpose.msk.msra.mxu1 %vm2975_vm11, %v2047_v49  ;;  %v2299_v54 = vpop.permute.xlu1 %2298  ;;  %v1061_v46 = vsel %vm1054_vm3, %v1044_v37, %v2280_v24  ;;  %v1062_v47 = vsel %vm1054_vm3, %v1045_v48, %v2281_v20 }
  0xc6   : > { %v2286_v9 = vunpack.i.h.bf16 %v2284_v53  ;;  %v2285_v8 = vunpack.i.l.bf16 %v2284_v53  ;;  %v2301_v30 = vunpack.i.h.bf16 %v2299_v54  ;;  %v2300_v36 = vunpack.i.l.bf16 %v2299_v54 }
  0xc8   : > { %v1078_v59 = vsel %vm1071_vm4, %v1061_v46, %v2285_v8  ;;  %v1079_v19 = vsel %vm1071_vm4, %v1062_v47, %v2286_v9 }
  0xc9   : > { %v2294_v56 = vpop.permute.xlu0 %2293  ;;  %v2309_v18 = vpop.permute.xlu1 %2308  ;;  %v1095_v12 = vsel %vm1088_vm5, %v1078_v59, %v2290_v58  ;;  %v1096_v27 = vsel %vm1088_vm5, %v1079_v19, %v2291_v57 }
  0xca   : > { %v2296_v22 = vunpack.i.h.bf16 %v2294_v56  ;;  %v2295_v7 = vunpack.i.l.bf16 %v2294_v56  ;;  %v2311_v3 = vunpack.i.h.bf16 %v2309_v18  ;;  %v2310_v50 = vunpack.i.l.bf16 %v2309_v18 }
  0xcc   : > { %v1112_v40 = vsel %vm1105_vm7, %v1095_v12, %v2295_v7  ;;  %v1113_v1 = vsel %vm1105_vm7, %v1096_v27, %v2296_v22 }
  0xcd   : > { %v2304_v0 = vpop.permute.xlu0 %2303  ;;  %v2319_v42 = vpop.permute.xlu1 %2318  ;;  %v1129_v60 = vsel %vm1122_vm8, %v1112_v40, %v2300_v36  ;;  %v1130_v13 = vsel %vm1122_vm8, %v1113_v1, %v2301_v30 }
  0xce   : > { %v2306_v6 = vunpack.i.h.bf16 %v2304_v0  ;;  %v2305_v52 = vunpack.i.l.bf16 %v2304_v0  ;;  %v2321_v29 = vunpack.i.h.bf16 %v2319_v42  ;;  %v2320_v4 = vunpack.i.l.bf16 %v2319_v42 }
  0xd0   : > { %v1146_v45 = vsel %vm1139_vm9, %v1129_v60, %v2305_v52  ;;  %v1147_v15 = vsel %vm1139_vm9, %v1130_v13, %v2306_v6 }
  0xd1   : > { %v1163_v16 = vsel %vm1156_vm10, %v1146_v45, %v2310_v50  ;;  %v1164_v17 = vsel %vm1156_vm10, %v1147_v15, %v2311_v3  ;;  %v2314_v21 = vpop.permute.xlu0 %2313  ;;  %v2329_v23 = vpop.permute.xlu1 %2328 }
  0xd2   : > { %v2053_v26 = vpack.c.bf16 %v1164_v17, %v1163_v16  ;;  %v2316_v14 = vunpack.i.h.bf16 %v2314_v21  ;;  %v2315_v28 = vunpack.i.l.bf16 %v2314_v21  ;;  %v2331_v34 = vunpack.i.h.bf16 %v2329_v23 }
  0xd3   : > { %v2330_v38 = vunpack.i.l.bf16 %v2329_v23 }
  0xd4   : > { %v1047_v31 = vsel %vm1037_vm2, %v2723_v5, %v2316_v14  ;;  %v1046_v2 = vsel %vm1037_vm2, %v2709_v61, %v2315_v28  ;;  %2055 = vmatprep.subr.msk.bf16.mxu0 %vm2975_vm11, %v2053_v26  ;;  %2086 = vmatprep.subr.msk.bf16.mxu1 %vm2975_vm11, %v2053_v26 }
  0xd5   : > { %v2324_v25 = vpop.permute.xlu0 %2323  ;;  %2058 = vmatpush3.bf16.xpose.msk.msra.mxu0 %vm2975_vm11, %v2053_v26  ;;  %2094 = vmatpush3.bf16.xpose.msk.msra.mxu1 %vm2975_vm11, %v2053_v26  ;;  %v2339_v35 = vpop.permute.xlu1 %2338  ;;  %v1063_v5 = vsel %vm1054_vm3, %v1046_v2, %v2320_v4  ;;  %v1064_v61 = vsel %vm1054_vm3, %v1047_v31, %v2321_v29 }
  0xd6   : > { %v2326_v39 = vunpack.i.h.bf16 %v2324_v25  ;;  %v2325_v33 = vunpack.i.l.bf16 %v2324_v25  ;;  %v2341_v32 = vunpack.i.h.bf16 %v2339_v35  ;;  %v2340_v48 = vunpack.i.l.bf16 %v2339_v35 }
  0xd8   : > { %v1080_v62 = vsel %vm1071_vm4, %v1063_v5, %v2325_v33  ;;  %v1081_v41 = vsel %vm1071_vm4, %v1064_v61, %v2326_v39 }
  0xd9   : > { %v2334_v49 = vpop.permute.xlu0 %2333  ;;  %v2349_v10 = vpop.permute.xlu1 %2348  ;;  %v1097_v24 = vsel %vm1088_vm5, %v1080_v62, %v2330_v38  ;;  %v1098_v51 = vsel %vm1088_vm5, %v1081_v41, %v2331_v34 }
  0xda   : > { %v2336_v11 = vunpack.i.h.bf16 %v2334_v49  ;;  %v2335_v20 = vunpack.i.l.bf16 %v2334_v49  ;;  %v2351_v9 = vunpack.i.h.bf16 %v2349_v10  ;;  %v2350_v8 = vunpack.i.l.bf16 %v2349_v10 }
  0xdc   : > { %v1114_v37 = vsel %vm1105_vm7, %v1097_v24, %v2335_v20  ;;  %v1115_v53 = vsel %vm1105_vm7, %v1098_v51, %v2336_v11 }
  0xdd   : > { %v2344_v54 = vpop.permute.xlu0 %2343  ;;  %v2359_v46 = vpop.permute.xlu1 %2358  ;;  %v1131_v58 = vsel %vm1122_vm8, %v1114_v37, %v2340_v48  ;;  %v1132_v59 = vsel %vm1122_vm8, %v1115_v53, %v2341_v32  ;;  %v2474_v53 = vld [vmem:[%s2608_s16 + $0x90] sm:$0xff] }
  0xde   : > { %v2346_v47 = vunpack.i.h.bf16 %v2344_v54  ;;  %v2345_v57 = vunpack.i.l.bf16 %v2344_v54  ;;  %v2361_v40 = vunpack.i.h.bf16 %v2359_v46  ;;  %v2360_v1 = vunpack.i.l.bf16 %v2359_v46 }
  0xe0   : > { %v1148_v19 = vsel %vm1139_vm9, %v1131_v58, %v2345_v57  ;;  %v1149_v56 = vsel %vm1139_vm9, %v1132_v59, %v2346_v47 }
  0xe1   : > { %v1165_v18 = vsel %vm1156_vm10, %v1148_v19, %v2350_v8  ;;  %v1166_v22 = vsel %vm1156_vm10, %v1149_v56, %v2351_v9  ;;  %v2354_v7 = vpop.permute.xlu0 %2353  ;;  %v2369_v12 = vpop.permute.xlu1 %2368 }
  0xe2   : > { %v2059_v27 = vpack.c.bf16 %v1166_v22, %v1165_v18  ;;  %v2356_v30 = vunpack.i.h.bf16 %v2354_v7  ;;  %v2355_v36 = vunpack.i.l.bf16 %v2354_v7  ;;  %v2371_v60 = vunpack.i.h.bf16 %v2369_v12 }
  0xe3   : > { %v2370_v13 = vunpack.i.l.bf16 %v2369_v12 }
  0xe4   : > { %v1049_v0 = vsel %vm1037_vm2, %v2860_v44, %v2356_v30  ;;  %v1048_v3 = vsel %vm1037_vm2, %v2857_v43, %v2355_v36  ;;  %2061 = vmatprep.subr.msk.bf16.mxu0 %vm2975_vm11, %v2059_v27  ;;  %2087 = vmatprep.subr.msk.bf16.mxu1 %vm2975_vm11, %v2059_v27 }
  0xe5   : > { %v2364_v50 = vpop.permute.xlu0 %2363  ;;  %2064 = vmatpush3.bf16.xpose.msk.msra.mxu0 %vm2975_vm11, %v2059_v27  ;;  %2095 = vmatpush3.bf16.xpose.msk.msra.mxu1 %vm2975_vm11, %v2059_v27  ;;  %v2379_v42 = vpop.permute.xlu1 %2378  ;;  %v1065_v44 = vsel %vm1054_vm3, %v1048_v3, %v2360_v1  ;;  %v1066_v43 = vsel %vm1054_vm3, %v1049_v0, %v2361_v40 }
  0xe6   : > { %v2366_v6 = vunpack.i.h.bf16 %v2364_v50  ;;  %v2365_v52 = vunpack.i.l.bf16 %v2364_v50  ;;  %v2381_v28 = vunpack.i.h.bf16 %v2379_v42  ;;  %v2380_v29 = vunpack.i.l.bf16 %v2379_v42 }
  0xe8   : > { %v1082_v45 = vsel %vm1071_vm4, %v1065_v44, %v2365_v52  ;;  %v1083_v15 = vsel %vm1071_vm4, %v1066_v43, %v2366_v6 }
  0xe9   : > { %v2374_v16 = vpop.permute.xlu0 %2373  ;;  %v2389_v17 = vpop.permute.xlu1 %2388  ;;  %v1099_v26 = vsel %vm1088_vm5, %v1082_v45, %v2370_v13  ;;  %v1100_v14 = vsel %vm1088_vm5, %v1083_v15, %v2371_v60 }
  0xea   : > { %v2376_v21 = vunpack.i.h.bf16 %v2374_v16  ;;  %v2375_v23 = vunpack.i.l.bf16 %v2374_v16  ;;  %v2391_v25 = vunpack.i.h.bf16 %v2389_v17  ;;  %v2390_v35 = vunpack.i.l.bf16 %v2389_v17 }
  0xec   : > { %v1116_v4 = vsel %vm1105_vm7, %v1099_v26, %v2375_v23  ;;  %v1117_v31 = vsel %vm1105_vm7, %v1100_v14, %v2376_v21 }
  0xed   : > { %v2384_v2 = vpop.permute.xlu0 %2383  ;;  %v2399_v39 = vpop.permute.xlu1 %2398  ;;  %v1133_v61 = vsel %vm1122_vm8, %v1116_v4, %v2380_v29  ;;  %v1134_v34 = vsel %vm1122_vm8, %v1117_v31, %v2381_v28  ;;  %v2475_v4 = vld [vmem:[%s2608_s16 + $0xb0] sm:$0xff] }
  0xee   : > { %v2386_v33 = vunpack.i.h.bf16 %v2384_v2  ;;  %v2385_v5 = vunpack.i.l.bf16 %v2384_v2  ;;  %v2401_v32 = vunpack.i.h.bf16 %v2399_v39  ;;  %v2400_v48 = vunpack.i.l.bf16 %v2399_v39  ;;  %v2476_v2 = vld [vmem:[%s2608_s16 + $0xa8] sm:$0xff] }
  0xf0   : > { %v1150_v38 = vsel %vm1139_vm9, %v1133_v61, %v2385_v5  ;;  %v1151_v62 = vsel %vm1139_vm9, %v1134_v34, %v2386_v33 }
  0xf1   : > { %v1167_v41 = vsel %vm1156_vm10, %v1150_v38, %v2390_v35  ;;  %v1168_v49 = vsel %vm1156_vm10, %v1151_v62, %v2391_v25  ;;  %v2394_v10 = vpop.permute.xlu0 %2393  ;;  %v2409_v11 = vpop.permute.xlu1 %2408 }
  0xf2   : > { %v2065_v20 = vpack.c.bf16 %v1168_v49, %v1167_v41  ;;  %v2396_v24 = vunpack.i.h.bf16 %v2394_v10  ;;  %v2395_v51 = vunpack.i.l.bf16 %v2394_v10  ;;  %v2411_v58 = vunpack.i.h.bf16 %v2409_v11 }
  0xf3   : > { %v2410_v59 = vunpack.i.l.bf16 %v2409_v11 }
  0xf4   : > { %v1051_v37 = vsel %vm1037_vm2, %v2719_v63, %v2396_v24  ;;  %v1050_v54 = vsel %vm1037_vm2, %v2474_v53, %v2395_v51  ;;  %2067 = vmatprep.subr.msk.bf16.mxu0 %vm2975_vm11, %v2065_v20  ;;  %2088 = vmatprep.subr.msk.bf16.mxu1 %vm2975_vm11, %v2065_v20 }
  0xf5   : > { %v2404_v9 = vpop.permute.xlu0 %2403  ;;  %2070 = vmatpush3.bf16.xpose.msk.msra.mxu0 %vm2975_vm11, %v2065_v20  ;;  %2096 = vmatpush3.bf16.xpose.msk.msra.mxu1 %vm2975_vm11, %v2065_v20  ;;  %v2419_v8 = vpop.permute.xlu1 %2418  ;;  %v1067_v63 = vsel %vm1054_vm3, %v1050_v54, %v2400_v48  ;;  %v1068_v57 = vsel %vm1054_vm3, %v1051_v37, %v2401_v32 }
  0xf6   : > { %v2406_v46 = vunpack.i.h.bf16 %v2404_v9  ;;  %v2405_v47 = vunpack.i.l.bf16 %v2404_v9  ;;  %v2421_v36 = vunpack.i.h.bf16 %v2419_v8  ;;  %v2420_v40 = vunpack.i.l.bf16 %v2419_v8 }
  0xf8   : > { %v1084_v19 = vsel %vm1071_vm4, %v1067_v63, %v2405_v47  ;;  %v1085_v56 = vsel %vm1071_vm4, %v1068_v57, %v2406_v46 }
  0xf9   : > { %v2414_v18 = vpop.permute.xlu0 %2413  ;;  %v2429_v22 = vpop.permute.xlu1 %2428  ;;  %v1101_v27 = vsel %vm1088_vm5, %v1084_v19, %v2410_v59  ;;  %v1102_v30 = vsel %vm1088_vm5, %v1085_v56, %v2411_v58 }
  0xfa   : > { %v2416_v7 = vunpack.i.h.bf16 %v2414_v18  ;;  %v2415_v12 = vunpack.i.l.bf16 %v2414_v18  ;;  %v2431_v50 = vunpack.i.h.bf16 %v2429_v22  ;;  %v2430_v42 = vunpack.i.l.bf16 %v2429_v22 }
  0xfc   : > { %v1118_v1 = vsel %vm1105_vm7, %v1101_v27, %v2415_v12  ;;  %v1119_v0 = vsel %vm1105_vm7, %v1102_v30, %v2416_v7  ;;  %v1174_v7 = vld [vmem:[%s3385_s3 + $0x8] sm:$0xff]  ;;  %v1175_v27 = vld [vmem:[%s3385_s3 + $0x10] sm:$0xff] }
  0xfd   : > { %v2424_v3 = vpop.permute.xlu0 %2423  ;;  %v2439_v6 = vpop.permute.xlu1 %2438  ;;  %v1135_v43 = vsel %vm1122_vm8, %v1118_v1, %v2420_v40  ;;  %v1136_v60 = vsel %vm1122_vm8, %v1119_v0, %v2421_v36  ;;  %v1182_v12 = vld [vmem:[%s3385_s3 + $0x48] sm:$0xff]  ;;  %v1183_v30 = vld [vmem:[%s3385_s3 + $0x50] sm:$0xff]  ;;  %v1184_v36 = vld [vmem:[%s3385_s3 + $0x58] sm:$0xff] }
  0xfe   : > { %v2426_v52 = vunpack.i.h.bf16 %v2424_v3  ;;  %v2425_v44 = vunpack.i.l.bf16 %v2424_v3  ;;  %v2441_v28 = vunpack.i.h.bf16 %v2439_v6  ;;  %v2440_v29 = vunpack.i.l.bf16 %v2439_v6  ;;  %v1177_v40 = vld [vmem:[%s3385_s3 + $0x20] sm:$0xff]  ;;  %v1178_v0 = vld [vmem:[%s3385_s3 + $0x28] sm:$0xff]  ;;  %v1180_v6 = vld [vmem:[%s3385_s3 + $0x38] sm:$0xff] }
  0xff   : > { %v1185_v1 = vld [vmem:[%s3385_s3 + $0x60] sm:$0xff]  ;;  %v1186_v3 = vld [vmem:[%s3385_s3 + $0x68] sm:$0xff] }
 0x100   : > { %v1152_v13 = vsel %vm1139_vm9, %v1135_v43, %v2425_v44  ;;  %v1153_v45 = vsel %vm1139_vm9, %v1136_v60, %v2426_v52  ;;  %v1188_v52 = vld [vmem:[%s3385_s3 + $0x78] sm:$0xff] }
 0x101   : > { %v1169_v15 = vsel %vm1156_vm10, %v1152_v13, %v2430_v42  ;;  %v1170_v16 = vsel %vm1156_vm10, %v1153_v45, %v2431_v50  ;;  %v2434_v17 = vpop.permute.xlu0 %2433  ;;  %v2449_v21 = vpop.permute.xlu1 %2448  ;;  %v1179_v50 = vld [vmem:[%s3385_s3 + $0x30] sm:$0xff] }
 0x102   : > { %v2071_v23 = vpack.c.bf16 %v1170_v16, %v1169_v15  ;;  %v2436_v26 = vunpack.i.h.bf16 %v2434_v17  ;;  %v2435_v14 = vunpack.i.l.bf16 %v2434_v17  ;;  %v2451_v38 = vunpack.i.h.bf16 %v2449_v21  ;;  %v1187_v42 = vld [vmem:[%s3385_s3 + $0x70] sm:$0xff] }
 0x103   : > { %v2450_v62 = vunpack.i.l.bf16 %v2449_v21 }
 0x104   : > { %v1053_v31 = vsel %vm1037_vm2, %v2475_v4, %v2436_v26  ;;  %v1052_v25 = vsel %vm1037_vm2, %v2476_v2, %v2435_v14  ;;  %2073 = vmatprep.subr.msk.bf16.mxu0 %vm2975_vm11, %v2071_v23  ;;  %2089 = vmatprep.subr.msk.bf16.mxu1 %vm2975_vm11, %v2071_v23 }
 0x105   : > { %v2444_v35 = vpop.permute.xlu0 %2443  ;;  %2076 = vmatpush3.bf16.xpose.msk.msra.mxu0 %vm2975_vm11, %v2071_v23  ;;  %2097 = vmatpush3.bf16.xpose.msk.msra.mxu1 %vm2975_vm11, %v2071_v23  ;;  %v2459_v39 = vpop.permute.xlu1 %2458  ;;  %v1069_v61 = vsel %vm1054_vm3, %v1052_v25, %v2440_v29  ;;  %v1070_v34 = vsel %vm1054_vm3, %v1053_v31, %v2441_v28 }
 0x106   : > { %v2446_v33 = vunpack.i.h.bf16 %v2444_v35  ;;  %v2445_v5 = vunpack.i.l.bf16 %v2444_v35  ;;  %v2461_v48 = vunpack.i.h.bf16 %v2459_v39  ;;  %v2460_v37 = vunpack.i.l.bf16 %v2459_v39 }
 0x108   : > { %v1086_v41 = vsel %vm1071_vm4, %v1069_v61, %v2445_v5  ;;  %v1087_v49 = vsel %vm1071_vm4, %v1070_v34, %v2446_v33 }
 0x109   : > { %v2454_v10 = vpop.permute.xlu0 %2453  ;;  %v2469_v24 = vpop.permute.xlu1 %2468  ;;  %v1103_v51 = vsel %vm1088_vm5, %v1086_v41, %v2450_v62  ;;  %v1104_v32 = vsel %vm1088_vm5, %v1087_v49, %v2451_v38 }
 0x10a   : > { %v2456_v11 = vunpack.i.h.bf16 %v2454_v10  ;;  %v2455_v20 = vunpack.i.l.bf16 %v2454_v10  ;;  %v2471_v8 = vunpack.i.h.bf16 %v2469_v24  ;;  %v2470_v46 = vunpack.i.l.bf16 %v2469_v24 }
 0x10c   : > { %v1120_v53 = vsel %vm1105_vm7, %v1103_v51, %v2455_v20  ;;  %v1121_v54 = vsel %vm1105_vm7, %v1104_v32, %v2456_v11 }
 0x10d   : > { %v2464_v9 = vpop.permute.xlu0 %2463  ;;  %v1137_v57 = vsel %vm1122_vm8, %v1120_v53, %v2460_v37  ;;  %v1138_v58 = vsel %vm1122_vm8, %v1121_v54, %v2461_v48 }
 0x10e   : > { %v2466_v47 = vunpack.i.h.bf16 %v2464_v9  ;;  %v2465_v63 = vunpack.i.l.bf16 %v2464_v9 }
 0x110   : > { %v1154_v59 = vsel %vm1139_vm9, %v1137_v57, %v2465_v63  ;;  %v1155_v19 = vsel %vm1139_vm9, %v1138_v58, %v2466_v47 }
 0x111   : > { %v1171_v56 = vsel %vm1156_vm10, %v1154_v59, %v2470_v46  ;;  %v1172_v18 = vsel %vm1156_vm10, %v1155_v19, %v2471_v8 }
 0x112   : > { %v2077_v22 = vpack.c.bf16 %v1172_v18, %v1171_v56 }
 0x114   : > { %2079 = vmatprep.subr.msk.bf16.mxu0 %vm2975_vm11, %v2077_v22  ;;  %2090 = vmatprep.subr.msk.bf16.mxu1 %vm2975_vm11, %v2077_v22 }
 0x115   : > { %2082 = vmatpush3.bf16.xpose.msk.msra.mxu0 %vm2975_vm11, %v2077_v22  ;;  %2098 = vmatpush3.bf16.xpose.msk.msra.mxu1 %vm2975_vm11, %v2077_v22 }
 0x11c   : > { %2012 = vmatmul.mubr.msk.f32.vlgmr.msra.gmra.mrb[0].mxu0 %vm1285_vm6, %v1174_v7  ;;  %2024 = vmatmul.mubr.msk.f32.vlgmr.msra.gmra.mrb[0].mxu1 %vm1285_vm6, %v1182_v12  ;;  %v1213_v43 = vpop.permute.xlu1 %1212 }
 0x11d   : > { %2014 = vmatprep.mubr.msk.f32.mxu0 %vm1285_vm6, %v1175_v27  ;;  %2026 = vmatprep.mubr.msk.f32.mxu1 %vm1285_vm6, %v1183_v30 }
 0x11e   : > { %v1208_v44 = vpop.permute.xlu0 %1207 }
 0x120   : > { %2015 = vmatmul.mubr.msk.f32.gmra.mrb[2].mxu0 %vm1285_vm6, %v1176_v55  ;;  %2027 = vmatmul.mubr.msk.f32.gmra.mrb[2].mxu1 %vm1285_vm6, %v1184_v36  ;;  %v1218_v13 = vpop.permute.xlu1 %1217 }
 0x121   : > { %2017 = vmatprep.mubr.msk.f32.mxu0 %vm1285_vm6, %v1177_v40  ;;  %2029 = vmatprep.mubr.msk.f32.mxu1 %vm1285_vm6, %v1185_v1 }
 0x122   : > { %v1223_v60 = vpop.permute.xlu0 %1222 }
 0x124   : > { %2018 = vmatmul.mubr.msk.f32.gmra.mrb[4].mxu0 %vm1285_vm6, %v1178_v0  ;;  %2030 = vmatmul.mubr.msk.f32.gmra.mrb[4].mxu1 %vm1285_vm6, %v1186_v3 }
 0x125   : > { %2020 = vmatprep.mubr.msk.f32.mxu0 %vm1285_vm6, %v1179_v50  ;;  %2032 = vmatprep.mubr.msk.f32.mxu1 %vm1285_vm6, %v1187_v42  ;;  %v1228_v15 = vpop.permute.xlu1 %1227 }
 0x126   : > { %v3273_v45 = vpop.permute.xlu0 %1232 }
 0x128   : > { %2021 = vmatmul.mubr.msk.f32.gmra.mrb[6].mxu0 %vm1285_vm6, %v1180_v6  ;;  %2033 = vmatmul.mubr.msk.f32.gmra.mrb[6].mxu1 %vm1285_vm6, %v1188_v52 }
 0x129   : > { %v3283_v17 = vpop.permute.xlu1 %1237 }
 0x12a   : > { %v3280_v16 = vpop.permute.xlu0 %1242 }
 0x12d   : > { %v1248_v2 = vpop.permute.xlu1 %1247 }
 0x12e   : > { %v1253_v21 = vpop.permute.xlu0 %1252 }
 0x131   : > { %v1258_v54 = vpop.permute.xlu1 %1257 }
 0x132   : > { %v1263_v53 = vpop.permute.xlu0 %1262 }
 0x135   : > { %v1268_v56 = vpop.permute.xlu1 %1267 }
 0x136   : > { %v1273_v19 = vpop.permute.xlu0 %1272 }
 0x139   : > { %v1278_v1 = vpop.permute.xlu1 %1277 }
 0x13a   : > { %v1283_v40 = vpop.permute.xlu0 %1282 }
 0x1ef   : > { %v2013_v23 = vpop.f32.mrb[0].mxu0  ;;  %v2025_v26 = vpop.f32.mrb[0].mxu1 }
 0x1f0   : > { %v1454_v14 = vadd.f32 %v2013_v23, %v1213_v43  ;;  %v1494_v28 = vadd.f32 %v2025_v26, %v1253_v21  ;;  %v1448_v29 = vpop.f32.mrb[1].mxu0  ;;  %v1488_v4 = vpop.f32.mrb[1].mxu1 }
 0x1f1   : > { %v1449_v31 = vadd.f32 %v1448_v29, %v1208_v44  ;;  %v1489_v39 = vadd.f32 %v1488_v4, %v1248_v2 }
 0x1f2   : > { %1545 = vadd.xlane.f32.xlu1 %v1494_v28  ;;  %1529 = vadd.xlane.f32.xlu0 %v1454_v14  ;;  %v1577_v41 = vmul.f32 %v1454_v14, %v1454_v14  ;;  %v1585_v51 = vmul.f32 %v1494_v28, %v1494_v28 }
 0x1f3   : > { %1640 = vst [vmem:[%s472_s12] sm:$0xff] %v1449_v31  ;;  %v2016_v25 = vpop.f32.mrb[2].mxu0  ;;  %v2028_v35 = vpop.f32.mrb[2].mxu1  ;;  %v1576_v49 = vmul.f32 %v1449_v31, %v1449_v31  ;;  %v1584_v32 = vmul.f32 %v1489_v39, %v1489_v39 }
 0x1f4   : > { %v1458_v33 = vpop.f32.mrb[3].mxu0  ;;  %v1498_v5 = vpop.f32.mrb[3].mxu1  ;;  %v1464_v48 = vadd.f32 %v2016_v25, %v1223_v60  ;;  %v1504_v9 = vadd.f32 %v2028_v35, %v1263_v53 }
 0x1f5   : > { %v1459_v37 = vadd.f32 %v1458_v33, %v1218_v13  ;;  %v1499_v8 = vadd.f32 %v1498_v5, %v1258_v54 }
 0x1f6   : > { %1543 = vadd.xlane.f32.xlu0 %v1489_v39  ;;  %1527 = vadd.xlane.f32.xlu1 %v1449_v31  ;;  %v1579_v46 = vmul.f32 %v1464_v48, %v1464_v48  ;;  %v1587_v63 = vmul.f32 %v1504_v9, %v1504_v9 }
 0x1f7   : > { %v2019_v61 = vpop.f32.mrb[4].mxu0  ;;  %v2031_v34 = vpop.f32.mrb[4].mxu1  ;;  %v1578_v47 = vmul.f32 %v1459_v37, %v1459_v37  ;;  %v1586_v57 = vmul.f32 %v1499_v8, %v1499_v8 }
 0x1f8   : > { %v1468_v38 = vpop.f32.mrb[5].mxu0  ;;  %v1508_v62 = vpop.f32.mrb[5].mxu1  ;;  %v1474_v58 = vadd.f32 %v2019_v61, %v3273_v45  ;;  %v1514_v18 = vadd.f32 %v2031_v34, %v1273_v19 }
 0x1f9   : > { %v1469_v59 = vadd.f32 %v1468_v38, %v1228_v15  ;;  %v1509_v22 = vadd.f32 %v1508_v62, %v1268_v56 }
 0x1fa   : > { %1594 = vadd.xlane.f32.xlu1 %v1577_v41  ;;  %1592 = vadd.xlane.f32.xlu0 %v1576_v49  ;;  %v1581_v7 = vmul.f32 %v1474_v58, %v1474_v58  ;;  %v1589_v27 = vmul.f32 %v1514_v18, %v1514_v18 }
 0x1fb   : > { %v2022_v10 = vpop.f32.mrb[6].mxu0  ;;  %v2034_v11 = vpop.f32.mrb[6].mxu1  ;;  %v1580_v12 = vmul.f32 %v1469_v59, %v1469_v59  ;;  %v1588_v30 = vmul.f32 %v1509_v22, %v1509_v22 }
 0x1fc   : > { %v1478_v20 = vpop.f32.mrb[7].mxu0  ;;  %v1518_v24 = vpop.f32.mrb[7].mxu1  ;;  %v1484_v55 = vadd.f32 %v2022_v10, %v3280_v16  ;;  %v1524_v0 = vadd.f32 %v2034_v11, %v1283_v40 }
 0x1fd   : > { %v1479_v36 = vadd.f32 %v1478_v20, %v3283_v17  ;;  %v1519_v3 = vadd.f32 %v1518_v24, %v1278_v1 }
 0x1fe   : > { %1610 = vadd.xlane.f32.xlu1 %v1585_v51  ;;  %1608 = vadd.xlane.f32.xlu0 %v1584_v32  ;;  %v1583_v50 = vmul.f32 %v1484_v55, %v1484_v55  ;;  %v1591_v6 = vmul.f32 %v1524_v0, %v1524_v0 }
 0x1ff   : > { %v1582_v42 = vmul.f32 %v1479_v36, %v1479_v36  ;;  %v1590_v52 = vmul.f32 %v1519_v3, %v1519_v3 }
 0x202   : > { %1533 = vadd.xlane.f32.xlu1 %v1464_v48  ;;  %1531 = vadd.xlane.f32.xlu0 %v1459_v37 }
 0x206   : > { %1549 = vadd.xlane.f32.xlu1 %v1504_v9  ;;  %1547 = vadd.xlane.f32.xlu0 %v1499_v8 }
 0x20a   : > { %1598 = vadd.xlane.f32.xlu1 %v1579_v46  ;;  %1596 = vadd.xlane.f32.xlu0 %v1578_v47 }
 0x20e   : > { %1614 = vadd.xlane.f32.xlu1 %v1587_v63  ;;  %1612 = vadd.xlane.f32.xlu0 %v1586_v57 }
 0x212   : > { %1537 = vadd.xlane.f32.xlu1 %v1474_v58  ;;  %1535 = vadd.xlane.f32.xlu0 %v1469_v59 }
 0x216   : > { %1553 = vadd.xlane.f32.xlu1 %v1514_v18  ;;  %1551 = vadd.xlane.f32.xlu0 %v1509_v22 }
 0x21a   : > { %1602 = vadd.xlane.f32.xlu1 %v1581_v7  ;;  %1600 = vadd.xlane.f32.xlu0 %v1580_v12 }
 0x21e   : > { %1618 = vadd.xlane.f32.xlu1 %v1589_v27  ;;  %1616 = vadd.xlane.f32.xlu0 %v1588_v30 }
 0x222   : > { %1541 = vadd.xlane.f32.xlu1 %v1484_v55  ;;  %1539 = vadd.xlane.f32.xlu0 %v1479_v36 }
 0x226   : > { %1557 = vadd.xlane.f32.xlu1 %v1524_v0  ;;  %1555 = vadd.xlane.f32.xlu0 %v1519_v3 }
 0x22a   : > { %1606 = vadd.xlane.f32.xlu1 %v1583_v50  ;;  %1604 = vadd.xlane.f32.xlu0 %v1582_v42 }
 0x22e   : > { %1622 = vadd.xlane.f32.xlu1 %v1591_v6  ;;  %1620 = vadd.xlane.f32.xlu0 %v1590_v52 }
 0x27f   : > { %v1546_v44 = vpop.xlane.xlu1 %1545  ;;  %v1530_v43 = vpop.xlane.xlu0 %1529 }
 0x280   : > { %1569 = vst.msk [vmem:[%s3296_s14 + $0x48] sm:$0xff] %vm1559_vm12, %v1546_v44  ;;  %1561 = vst.msk [vmem:[%s3296_s14 + $0x8] sm:$0xff] %vm1559_vm12, %v1530_v43 }
 0x283   : > { %v1544_v60 = vpop.xlane.xlu0 %1543  ;;  %v1528_v13 = vpop.xlane.xlu1 %1527 }
 0x284   : > { %1568 = vst.msk [vmem:[%s3296_s14 + $0x40] sm:$0xff] %vm1559_vm12, %v1544_v60  ;;  %1560 = vst.msk [vmem:[%s3296_s14] sm:$0xff] %vm1559_vm12, %v1528_v13 }
 0x287   : > { %v1595_v45 = vpop.xlane.xlu1 %1594  ;;  %v1593_v15 = vpop.xlane.xlu0 %1592 }
 0x288   : > { %1625 = vst.msk [vmem:[%s3309_s10 + $0x8] sm:$0xff] %vm1559_vm12, %v1595_v45  ;;  %1624 = vst.msk [vmem:[%s3309_s10] sm:$0xff] %vm1559_vm12, %v1593_v15 }
 0x28b   : > { %v1611_v16 = vpop.xlane.xlu1 %1610  ;;  %v1609_v17 = vpop.xlane.xlu0 %1608 }
 0x28c   : > { %1633 = vst.msk [vmem:[%s3309_s10 + $0x48] sm:$0xff] %vm1559_vm12, %v1611_v16  ;;  %1632 = vst.msk [vmem:[%s3309_s10 + $0x40] sm:$0xff] %vm1559_vm12, %v1609_v17 }
 0x28f   : > { %v1534_v21 = vpop.xlane.xlu1 %1533  ;;  %v1532_v23 = vpop.xlane.xlu0 %1531 }
 0x290   : > { %1563 = vst.msk [vmem:[%s3296_s14 + $0x18] sm:$0xff] %vm1559_vm12, %v1534_v21  ;;  %1562 = vst.msk [vmem:[%s3296_s14 + $0x10] sm:$0xff] %vm1559_vm12, %v1532_v23 }
 0x293   : > { %v1550_v26 = vpop.xlane.xlu1 %1549  ;;  %v1548_v14 = vpop.xlane.xlu0 %1547 }
 0x294   : > { %1571 = vst.msk [vmem:[%s3296_s14 + $0x58] sm:$0xff] %vm1559_vm12, %v1550_v26  ;;  %1570 = vst.msk [vmem:[%s3296_s14 + $0x50] sm:$0xff] %vm1559_vm12, %v1548_v14 }
 0x297   : > { %v1599_v28 = vpop.xlane.xlu1 %1598  ;;  %v1597_v29 = vpop.xlane.xlu0 %1596 }
 0x298   : > { %1627 = vst.msk [vmem:[%s3309_s10 + $0x18] sm:$0xff] %vm1559_vm12, %v1599_v28  ;;  %1626 = vst.msk [vmem:[%s3309_s10 + $0x10] sm:$0xff] %vm1559_vm12, %v1597_v29 }
 0x29b   : > { %v1615_v4 = vpop.xlane.xlu1 %1614  ;;  %v1613_v31 = vpop.xlane.xlu0 %1612 }
 0x29c   : > { %1635 = vst.msk [vmem:[%s3309_s10 + $0x58] sm:$0xff] %vm1559_vm12, %v1615_v4  ;;  %1634 = vst.msk [vmem:[%s3309_s10 + $0x50] sm:$0xff] %vm1559_vm12, %v1613_v31 }
 0x29f   : > { %v1538_v2 = vpop.xlane.xlu1 %1537  ;;  %v1536_v25 = vpop.xlane.xlu0 %1535 }
 0x2a0   : > { %1565 = vst.msk [vmem:[%s3296_s14 + $0x28] sm:$0xff] %vm1559_vm12, %v1538_v2  ;;  %1564 = vst.msk [vmem:[%s3296_s14 + $0x20] sm:$0xff] %vm1559_vm12, %v1536_v25 }
 0x2a3   : > { %v1554_v35 = vpop.xlane.xlu1 %1553  ;;  %v1552_v39 = vpop.xlane.xlu0 %1551 }
 0x2a4   : > { %1573 = vst.msk [vmem:[%s3296_s14 + $0x68] sm:$0xff] %vm1559_vm12, %v1554_v35  ;;  %1572 = vst.msk [vmem:[%s3296_s14 + $0x60] sm:$0xff] %vm1559_vm12, %v1552_v39 }
 0x2a7   : > { %v1603_v33 = vpop.xlane.xlu1 %1602  ;;  %v1601_v5 = vpop.xlane.xlu0 %1600 }
 0x2a8   : > { %1629 = vst.msk [vmem:[%s3309_s10 + $0x28] sm:$0xff] %vm1559_vm12, %v1603_v33  ;;  %1628 = vst.msk [vmem:[%s3309_s10 + $0x20] sm:$0xff] %vm1559_vm12, %v1601_v5 }
 0x2ab   : > { %v1619_v61 = vpop.xlane.xlu1 %1618  ;;  %v1617_v34 = vpop.xlane.xlu0 %1616 }
 0x2ac   : > { %1637 = vst.msk [vmem:[%s3309_s10 + $0x68] sm:$0xff] %vm1559_vm12, %v1619_v61  ;;  %1636 = vst.msk [vmem:[%s3309_s10 + $0x60] sm:$0xff] %vm1559_vm12, %v1617_v34 }
 0x2af   : > { %v1542_v38 = vpop.xlane.xlu1 %1541  ;;  %v1540_v62 = vpop.xlane.xlu0 %1539 }
 0x2b0   : > { %1567 = vst.msk [vmem:[%s3296_s14 + $0x38] sm:$0xff] %vm1559_vm12, %v1542_v38  ;;  %1566 = vst.msk [vmem:[%s3296_s14 + $0x30] sm:$0xff] %vm1559_vm12, %v1540_v62 }
 0x2b3   : > { %v1558_v41 = vpop.xlane.xlu1 %1557  ;;  %v1556_v49 = vpop.xlane.xlu0 %1555 }
 0x2b4   : > { %1575 = vst.msk [vmem:[%s3296_s14 + $0x78] sm:$0xff] %vm1559_vm12, %v1558_v41  ;;  %1574 = vst.msk [vmem:[%s3296_s14 + $0x70] sm:$0xff] %vm1559_vm12, %v1556_v49 }
 0x2b7   : > { %v1607_v10 = vpop.xlane.xlu1 %1606  ;;  %v1605_v11 = vpop.xlane.xlu0 %1604 }
 0x2b8   : > { %1631 = vst.msk [vmem:[%s3309_s10 + $0x38] sm:$0xff] %vm1559_vm12, %v1607_v10  ;;  %1630 = vst.msk [vmem:[%s3309_s10 + $0x30] sm:$0xff] %vm1559_vm12, %v1605_v11 }
 0x2bb   : > { %v1623_v20 = vpop.xlane.xlu1 %1622  ;;  %v1621_v24 = vpop.xlane.xlu0 %1620 }
 0x2bc   : > { %1639 = vst.msk [vmem:[%s3309_s10 + $0x78] sm:$0xff] %vm1559_vm12, %v1623_v20  ;;  %1638 = vst.msk [vmem:[%s3309_s10 + $0x70] sm:$0xff] %vm1559_vm12, %v1621_v24 }
 0x2bd PF: > { %s18_s28 = sadd.s32 1, %s2515_s28   ;;  %s3392_s24 = smov %s2507_s26 }
 0x2be   : > { %p15_p10 = scmp.ge.s32.totalorder %s18_s28, 6   ;;  %s3393_s25 = smov %s2511_s27 }
 0x2bf   : > { %s3394_s26 = smov %s3397_s29  ;;  %s3395_s27 = smov %s3401_s30 }
 0x2c0   :  { %17 = sbr.rel (!%p15_p10) target bundleno = 3 (0x3), region = 100 }

</bundles_post_ra>
